<compile_context>
chip_gen: v6e
topology: v6e:2x2x1
jax: 0.10.0
libtpu: 0.0.40
codegen_flags: <defaults>
</compile_context>

<pallas_src>
import functools

import jax
import jax.numpy as jnp
from jax.experimental import pallas as pl
from jax.experimental.pallas import tpu as pltpu

# hyper-parameters implied by the reference module (vocab_len is data-driven
# in the reference; fixed to a small deterministic value here).
VOCAB_LEN = 96
VOCAB_PAD = 128          # lane-dense padded vocab used inside the kernel
N_EMB = 64
CONTEXT_LENGTH = 8
N_HEADS = 8
HEAD_SIZE = N_EMB // N_HEADS
N_LAYERS = 2

# single-pass bf16 MXU with f32 accumulation for every in-kernel dot
_DOT = dict(preferred_element_type=jnp.float32,
            precision=jax.lax.Precision.DEFAULT)


def lyric_kernel(x_ref, aw_ref, w1_ref, w2_ref, vec_ref, b1_ref, fcl_ref,
                 aux_ref, maskv_ref, out_ref, *, B, T, D, H, L, Vp):
    BT = B * T            # 16
    HBT = H * BT          # 128

    x = x_ref[...]                       # (BT, D) token+pos embedding (gathered in XLA)
    vecs = vec_ref[...]                  # (6L+2, D): packed LN params + small biases
    b1_all = b1_ref[...]                 # (L, 4D)
    attn_bias = aux_ref[0:BT, :]         # (BT, HBT)  additive 0 / -1e30 cross-batch mask
    ones_bd = aux_ref[BT:BT + HBT, :]    # (HBT, HBT) per-head block-diagonal ones
    mask_v = maskv_ref[...]              # (HBT, D)   block-diagonal head-packing mask

    def vrow(i):                         # (1, D) static value slice of the packed vectors
        return vecs[i:i + 1, :]

    def layer_norm(h, g, b):
        mu = jnp.mean(h, axis=-1, keepdims=True)
        var = jnp.mean((h - mu) * (h - mu), axis=-1, keepdims=True)
        return (h - mu) * jax.lax.rsqrt(var + 1e-5) * g + b

    for l in range(L):                   # static unroll over layers
        base = 6 * l
        # -------------------- multi-head self attention --------------------
        h = layer_norm(x, vrow(base + 0), vrow(base + 1))            # (BT, D)
        # replicate rows once per head (sublane-aligned copies), reused for K & V
        h_rep = jnp.concatenate([h] * H, axis=0)                     # (HBT, D)

        q = jnp.dot(h, aw_ref[4 * l + 0], **_DOT)                    # (BT, D)
        # block-diagonal packed keys / values:
        #   k_blk[c, d] = k[c % BT, d] if head(d) == c // BT else 0  (same for v)
        k_blk = jnp.dot(h_rep, aw_ref[4 * l + 1], **_DOT) * mask_v   # (HBT, D)
        v_blk = jnp.dot(h_rep, aw_ref[4 * l + 2], **_DOT) * mask_v   # (HBT, D)

        # all-head scores in one lane-dense matmul: column block hh holds q_hh @ k_hh^T
        # TODO(synk): reference `tril` buffer is all ones -> masked_fill masks nothing
        # (no causal mask) and scores are NOT scaled by 1/sqrt(head_size).
        s = jax.lax.dot_general(q, k_blk, (((1,), (1,)), ((), ())),
                                **_DOT) + attn_bias                  # (BT, HBT)
        # segmented softmax over each 16-column head block; subtracting the GLOBAL
        # row max is valid (it is constant per row, hence constant within each block).
        p = jnp.exp(s - jnp.max(s, axis=-1, keepdims=True))
        denom = jnp.dot(p, ones_bd, **_DOT)     # per-block sums broadcast over the block
        p = p / denom                           # exact divide (keeps tolerance budget)
        # heads gathered + feature-concatenated by one block-diagonal matmul
        # TODO(synk): reference torch.cat(...) defaults to dim=0 (shape-inconsistent);
        # the intended feature-dim concat is what this computes.
        o = jnp.dot(p, v_blk, **_DOT)                                # (BT, D)

        sa = jnp.dot(o, aw_ref[4 * l + 3], **_DOT) + vrow(base + 4)
        x = x + sa                                                   # residual

        # ---------------------------- feed forward --------------------------
        h2 = layer_norm(x, vrow(base + 2), vrow(base + 3))           # (BT, D)
        f1 = jnp.maximum(jnp.dot(h2, w1_ref[l], **_DOT)
                         + b1_all[l:l + 1, :], 0.0)                  # (BT, 4D)
        f2 = jnp.dot(f1, w2_ref[l], **_DOT) + vrow(base + 5)
        # TODO(synk): nn.Dropout(0.2) is identity in eval mode.
        x = x + f2                                                   # residual

    # --------------------- final LN + vocab projection -----------------------
    xf = layer_norm(x, vrow(6 * L), vrow(6 * L + 1))                 # (BT, D)
    logits = jnp.dot(xf, fcl_ref[0:D, :], **_DOT) + fcl_ref[D:D + 1, :]   # (BT, Vp)

    # F.softmax(x) with implicit dim on a 3-D tensor -> legacy dim=0 (batch axis).
    # Rows b*T:(b+1)*T belong to batch b; reduce over the B row-blocks.
    m0 = logits[0:T, :]
    for b in range(1, B):
        m0 = jnp.maximum(m0, logits[b * T:(b + 1) * T, :])
    e_blocks = [jnp.exp(logits[b * T:(b + 1) * T, :] - m0) for b in range(B)]
    s0 = e_blocks[0]
    for b in range(1, B):
        s0 = s0 + e_blocks[b]
    inv = 1.0 / s0   # exact divide: keeps the directly-compared output tight
    for b in range(B):
        out_ref[b * T:(b + 1) * T, :] = e_blocks[b] * inv


def lyric_forward(tokens, params):
    B, T = tokens.shape
    D, H, L, V, Vp = N_EMB, N_HEADS, N_LAYERS, VOCAB_LEN, VOCAB_PAD
    hs = D // H
    BT = B * T
    HBT = H * BT

    # token + position embedding gathered in plain XLA (a 16-row gather is free)
    x0 = (params['tok_tab'][tokens.reshape(BT)]
          + jnp.tile(params['pos_tab'][:T], (B, 1))).astype(jnp.float32)

    # fuse per-head Q/K/V weights (L,H,D,hs) -> (L,D,D); stack with proj -> (4L,D,D)
    def fuse(w):
        return jnp.transpose(w, (0, 2, 1, 3)).reshape(L, D, D)
    attn_w = jnp.stack([fuse(params['wq']), fuse(params['wk']),
                        fuse(params['wv']), params['wproj']],
                       axis=1).reshape(4 * L, D, D)

    # pack all tiny (·, D) parameters into one operand (fewer prologue DMAs)
    rows = []
    for l in range(L):
        rows += [params['ln1_g'][l, 0], params['ln1_b'][l, 0],
                 params['ln2_g'][l, 0], params['ln2_b'][l, 0],
                 params['bproj'][l, 0], params['b2'][l, 0]]
    rows += [params['lnf_g'][0], params['lnf_b'][0]]
    vec64 = jnp.stack(rows, axis=0).astype(jnp.float32)              # (6L+2, D)

    b1 = params['b1'].reshape(L, 4 * D)                              # (L, 4D)

    # vocab padded 96 -> 128 (lane-dense); row D of fclw carries the bias
    fclw = jnp.zeros((D + 1, Vp), jnp.float32)
    fclw = fclw.at[:D, :V].set(params['wfcl'])
    fclw = fclw.at[D, :V].set(params['bfcl'][0])

    # static attention-structure constants, precomputed once (not built in-kernel)
    r = jnp.arange(BT)
    c = jnp.arange(HBT)
    d = jnp.arange(D)
    attn_bias = jnp.where(r[:, None] // T == (c[None, :] % BT) // T,
                          0.0, -1e30).astype(jnp.float32)            # (BT, HBT)
    ones_bd = (c[:, None] // BT == c[None, :] // BT).astype(jnp.float32)   # (HBT, HBT)
    aux128 = jnp.concatenate([attn_bias, ones_bd], axis=0)           # (BT+HBT, HBT)
    mask_v = (c[:, None] // BT == d[None, :] // hs).astype(jnp.float32)    # (HBT, D)

    inputs = (x0, attn_w, params['w1'], params['w2'], vec64, b1, fclw,
              aux128, mask_v)
    kern = functools.partial(lyric_kernel, B=B, T=T, D=D, H=H, L=L, Vp=Vp)
    # Whole problem (< 1 MiB) fits easily in VMEM on every generation (incl.
    # v7x's 64 MiB) -> single grid-less invocation, everything VMEM-resident.
    # (If B/T/L ever grow, add a batch grid axis with dimension_semantics=
    #  ("parallel",) and an index_map over L to stream layer weights.)
    out = pl.pallas_call(
        kern,
        out_shape=jax.ShapeDtypeStruct((BT, Vp), jnp.float32),
        in_specs=[pl.BlockSpec(memory_space=pltpu.MemorySpace.VMEM)
                  for _ in inputs],
        out_specs=pl.BlockSpec(memory_space=pltpu.MemorySpace.VMEM),
    )(*inputs)
    return out.reshape(B, T, Vp)[:, :, :V]


def init_params(key):
    D, V, T, H, L = N_EMB, VOCAB_LEN, CONTEXT_LENGTH, N_HEADS, N_LAYERS
    hs = D // H
    ks = jax.random.split(key, 14)

    def nrm(k, shape, scale=0.02):
        return (scale * jax.random.normal(k, shape)).astype(jnp.float32)

    return dict(
        tok_tab=nrm(ks[0], (V, D)),
        pos_tab=nrm(ks[1], (T, D)),
        ln1_g=jnp.ones((L, 1, D), jnp.float32),
        ln1_b=jnp.zeros((L, 1, D), jnp.float32),
        wq=nrm(ks[2], (L, H, D, hs)),
        wk=nrm(ks[3], (L, H, D, hs)),
        wv=nrm(ks[4], (L, H, D, hs)),
        wproj=nrm(ks[5], (L, D, D)),
        bproj=nrm(ks[6], (L, 1, D)),
        ln2_g=jnp.ones((L, 1, D), jnp.float32),
        ln2_b=jnp.zeros((L, 1, D), jnp.float32),
        w1=nrm(ks[7], (L, D, 4 * D)),
        b1=nrm(ks[8], (L, 1, 4 * D)),
        w2=nrm(ks[9], (L, 4 * D, D)),
        b2=nrm(ks[10], (L, 1, D)),
        lnf_g=jnp.ones((1, D), jnp.float32),
        lnf_b=jnp.zeros((1, D), jnp.float32),
        wfcl=nrm(ks[11], (D, V)),
        bfcl=nrm(ks[12], (1, V)),
    )


def ref_forward(tokens, params):
    """Pure-JAX reference (mirrors the PyTorch forward semantics, unfused)."""
    B, T = tokens.shape
    D, H, L = N_EMB, N_HEADS, N_LAYERS

    def ln(h, g, b):
        mu = jnp.mean(h, -1, keepdims=True)
        var = jnp.mean((h - mu) ** 2, -1, keepdims=True)
        return (h - mu) / jnp.sqrt(var + 1e-5) * g + b

    x = params['tok_tab'][tokens] + params['pos_tab'][None, :T]
    for l in range(L):
        h = ln(x, params['ln1_g'][l], params['ln1_b'][l])
        heads = []
        for hh in range(H):
            q = h @ params['wq'][l, hh]
            k = h @ params['wk'][l, hh]
            v = h @ params['wv'][l, hh]
            s = jnp.einsum('btk,bsk->bts', q, k)
            p = jax.nn.softmax(s, axis=-1)
            heads.append(jnp.einsum('bts,bsk->btk', p, v))
        sa = jnp.concatenate(heads, -1) @ params['wproj'][l] + params['bproj'][l]
        x = x + sa
        h2 = ln(x, params['ln2_g'][l], params['ln2_b'][l])
        f = jnp.maximum(h2 @ params['w1'][l] + params['b1'][l], 0.0)
        x = x + (f @ params['w2'][l] + params['b2'][l])
    xf = ln(x, params['lnf_g'], params['lnf_b'])
    logits = xf @ params['wfcl'] + params['bfcl']
    return jax.nn.softmax(logits, axis=0)   # legacy implicit-dim behaviour


if __name__ == "__main__":
    key = jax.random.PRNGKey(0)
    k_tok, k_par = jax.random.split(key)
    params = init_params(k_par)
    tokens = jax.random.randint(k_tok, (2, CONTEXT_LENGTH), 0, VOCAB_LEN,
                                dtype=jnp.int32)

    out = jax.block_until_ready(lyric_forward(tokens, params))
    ref = ref_forward(tokens, params)

    assert out.shape == (2, CONTEXT_LENGTH, VOCAB_LEN)
    assert bool(jnp.all(jnp.isfinite(out)))
    # softmax over dim 0 -> columns over the batch axis sum to 1
    assert bool(jnp.allclose(jnp.sum(out, axis=0), 1.0, atol=1e-4))
    assert bool(jnp.allclose(out, ref, atol=2e-3, rtol=2e-2))
    print("KERNEL_OK")
</pallas_src>

<mosaic_0001>
module attributes {stable_mosaic.version = 11 : i64} {
  func.func @lyric_kernel(%arg0: memref<16x64xf32, #tpu.memory_space<vmem>>, %arg1: memref<8x64x64xf32, #tpu.memory_space<vmem>>, %arg2: memref<2x64x256xf32, #tpu.memory_space<vmem>>, %arg3: memref<2x256x64xf32, #tpu.memory_space<vmem>>, %arg4: memref<14x64xf32, #tpu.memory_space<vmem>>, %arg5: memref<2x256xf32, #tpu.memory_space<vmem>>, %arg6: memref<65x128xf32, #tpu.memory_space<vmem>>, %arg7: memref<144x128xf32, #tpu.memory_space<vmem>>, %arg8: memref<128x64xf32, #tpu.memory_space<vmem>>, %arg9: memref<16x128xf32, #tpu.memory_space<vmem>>) attributes {dimension_semantics = [], scalar_prefetch = 0 : i64, scratch_operands = 0 : i64, tpu.core_type = #tpu.core_type<tc>} {
    %c0 = arith.constant 0 : index
    %c0_0 = arith.constant 0 : index
    %0 = vector.load %arg0[%c0, %c0_0] : memref<16x64xf32, #tpu.memory_space<vmem>>, vector<16x64xf32>
    %c0_1 = arith.constant 0 : index
    %c0_2 = arith.constant 0 : index
    %1 = vector.load %arg4[%c0_1, %c0_2] : memref<14x64xf32, #tpu.memory_space<vmem>>, vector<14x64xf32>
    %c0_3 = arith.constant 0 : index
    %c0_4 = arith.constant 0 : index
    %2 = vector.load %arg5[%c0_3, %c0_4] : memref<2x256xf32, #tpu.memory_space<vmem>>, vector<2x256xf32>
    %c0_5 = arith.constant 0 : index
    %c0_6 = arith.constant 0 : index
    %3 = vector.load %arg7[%c0_5, %c0_6] : memref<144x128xf32, #tpu.memory_space<vmem>>, vector<16x128xf32>
    %c16 = arith.constant 16 : index
    %c0_7 = arith.constant 0 : index
    %4 = vector.load %arg7[%c16, %c0_7] : memref<144x128xf32, #tpu.memory_space<vmem>>, vector<128x128xf32>
    %c0_8 = arith.constant 0 : index
    %c0_9 = arith.constant 0 : index
    %5 = vector.load %arg8[%c0_8, %c0_9] : memref<128x64xf32, #tpu.memory_space<vmem>>, vector<128x64xf32>
    %6 = vector.extract_strided_slice %1 {offsets = [0, 0], sizes = [1, 64], strides = [1, 1]} : vector<14x64xf32> to vector<1x64xf32>
    %7 = vector.extract_strided_slice %1 {offsets = [1, 0], sizes = [1, 64], strides = [1, 1]} : vector<14x64xf32> to vector<1x64xf32>
    %cst = arith.constant dense<0.000000e+00> : vector<16xf32>
    %8 = vector.multi_reduction <add>, %0, %cst [1] : vector<16x64xf32> to vector<16xf32>
    %9 = vector.shape_cast %8 : vector<16xf32> to vector<16x1xf32>
    %cst_10 = arith.constant 6.400000e+01 : f32
    %10 = vector.broadcast %cst_10 : f32 to vector<16x1xf32>
    %11 = arith.divf %9, %10 : vector<16x1xf32>
    %12 = vector.broadcast %11 : vector<16x1xf32> to vector<16x64xf32>
    %13 = arith.subf %0, %12 : vector<16x64xf32>
    %14 = vector.broadcast %11 : vector<16x1xf32> to vector<16x64xf32>
    %15 = arith.subf %0, %14 : vector<16x64xf32>
    %16 = arith.mulf %13, %15 : vector<16x64xf32>
    %cst_11 = arith.constant dense<0.000000e+00> : vector<16xf32>
    %17 = vector.multi_reduction <add>, %16, %cst_11 [1] : vector<16x64xf32> to vector<16xf32>
    %18 = vector.shape_cast %17 : vector<16xf32> to vector<16x1xf32>
    %cst_12 = arith.constant 6.400000e+01 : f32
    %19 = vector.broadcast %cst_12 : f32 to vector<16x1xf32>
    %20 = arith.divf %18, %19 : vector<16x1xf32>
    %21 = vector.broadcast %11 : vector<16x1xf32> to vector<16x64xf32>
    %22 = arith.subf %0, %21 : vector<16x64xf32>
    %cst_13 = arith.constant 9.99999974E-6 : f32
    %23 = vector.broadcast %cst_13 : f32 to vector<16x1xf32>
    %24 = arith.addf %20, %23 : vector<16x1xf32>
    %25 = math.rsqrt %24 : vector<16x1xf32>
    %26 = vector.broadcast %25 : vector<16x1xf32> to vector<16x64xf32>
    %27 = arith.mulf %22, %26 : vector<16x64xf32>
    %28 = vector.broadcast %6 : vector<1x64xf32> to vector<16x64xf32>
    %29 = arith.mulf %27, %28 : vector<16x64xf32>
    %30 = vector.broadcast %7 : vector<1x64xf32> to vector<16x64xf32>
    %31 = arith.addf %29, %30 : vector<16x64xf32>
    %32 = tpu.concatenate %31, %31, %31, %31, %31, %31, %31, %31 in 0 : vector<16x64xf32>, vector<16x64xf32>, vector<16x64xf32>, vector<16x64xf32>, vector<16x64xf32>, vector<16x64xf32>, vector<16x64xf32>, vector<16x64xf32> -> vector<128x64xf32>
    %c0_14 = arith.constant 0 : index
    %c0_15 = arith.constant 0 : index
    %c0_16 = arith.constant 0 : index
    %33 = vector.load %arg1[%c0_14, %c0_15, %c0_16] : memref<8x64x64xf32, #tpu.memory_space<vmem>>, vector<1x64x64xf32>
    %34 = vector.shape_cast %33 : vector<1x64x64xf32> to vector<64x64xf32>
    %cst_17 = arith.constant dense<0.000000e+00> : vector<16x64xf32>
    %35 = tpu.matmul %31, %34, %cst_17 {dimension_numbers = #tpu.dot_dimension_numbers<[1], [0], [0], [1], [0, 0, 1, 1], [], []>} : vector<16x64xf32>, vector<64x64xf32>, vector<16x64xf32> -> vector<16x64xf32>
    %c1 = arith.constant 1 : index
    %c0_18 = arith.constant 0 : index
    %c0_19 = arith.constant 0 : index
    %36 = vector.load %arg1[%c1, %c0_18, %c0_19] : memref<8x64x64xf32, #tpu.memory_space<vmem>>, vector<1x64x64xf32>
    %37 = vector.shape_cast %36 : vector<1x64x64xf32> to vector<64x64xf32>
    %cst_20 = arith.constant dense<0.000000e+00> : vector<128x64xf32>
    %38 = tpu.matmul %32, %37, %cst_20 {dimension_numbers = #tpu.dot_dimension_numbers<[1], [0], [0], [1], [0, 0, 1, 1], [], []>} : vector<128x64xf32>, vector<64x64xf32>, vector<128x64xf32> -> vector<128x64xf32>
    %39 = arith.mulf %38, %5 : vector<128x64xf32>
    %c2 = arith.constant 2 : index
    %c0_21 = arith.constant 0 : index
    %c0_22 = arith.constant 0 : index
    %40 = vector.load %arg1[%c2, %c0_21, %c0_22] : memref<8x64x64xf32, #tpu.memory_space<vmem>>, vector<1x64x64xf32>
    %41 = vector.shape_cast %40 : vector<1x64x64xf32> to vector<64x64xf32>
    %cst_23 = arith.constant dense<0.000000e+00> : vector<128x64xf32>
    %42 = tpu.matmul %32, %41, %cst_23 {dimension_numbers = #tpu.dot_dimension_numbers<[1], [0], [0], [1], [0, 0, 1, 1], [], []>} : vector<128x64xf32>, vector<64x64xf32>, vector<128x64xf32> -> vector<128x64xf32>
    %43 = arith.mulf %42, %5 : vector<128x64xf32>
    %cst_24 = arith.constant dense<0.000000e+00> : vector<16x128xf32>
    %44 = tpu.matmul %35, %39, %cst_24 {dimension_numbers = #tpu.dot_dimension_numbers<[1], [1], [0], [0], [0, 0, 1, 0], [], []>} : vector<16x64xf32>, vector<128x64xf32>, vector<16x128xf32> -> vector<16x128xf32>
    %45 = arith.addf %44, %3 : vector<16x128xf32>
    %cst_25 = arith.constant dense<0xFF800000> : vector<16xf32>
    %46 = vector.multi_reduction <maximumf>, %45, %cst_25 [1] : vector<16x128xf32> to vector<16xf32>
    %47 = vector.shape_cast %46 : vector<16xf32> to vector<16x1xf32>
    %48 = vector.broadcast %47 : vector<16x1xf32> to vector<16x128xf32>
    %49 = arith.subf %45, %48 : vector<16x128xf32>
    %50 = math.exp %49 : vector<16x128xf32>
    %cst_26 = arith.constant dense<0.000000e+00> : vector<16x128xf32>
    %51 = tpu.matmul %50, %4, %cst_26 {dimension_numbers = #tpu.dot_dimension_numbers<[1], [0], [0], [1], [0, 0, 1, 1], [], []>} : vector<16x128xf32>, vector<128x128xf32>, vector<16x128xf32> -> vector<16x128xf32>
    %52 = arith.divf %50, %51 : vector<16x128xf32>
    %cst_27 = arith.constant dense<0.000000e+00> : vector<16x64xf32>
    %53 = tpu.matmul %52, %43, %cst_27 {dimension_numbers = #tpu.dot_dimension_numbers<[1], [0], [0], [1], [0, 0, 1, 1], [], []>} : vector<16x128xf32>, vector<128x64xf32>, vector<16x64xf32> -> vector<16x64xf32>
    %c3 = arith.constant 3 : index
    %c0_28 = arith.constant 0 : index
    %c0_29 = arith.constant 0 : index
    %54 = vector.load %arg1[%c3, %c0_28, %c0_29] : memref<8x64x64xf32, #tpu.memory_space<vmem>>, vector<1x64x64xf32>
    %55 = vector.shape_cast %54 : vector<1x64x64xf32> to vector<64x64xf32>
    %cst_30 = arith.constant dense<0.000000e+00> : vector<16x64xf32>
    %56 = tpu.matmul %53, %55, %cst_30 {dimension_numbers = #tpu.dot_dimension_numbers<[1], [0], [0], [1], [0, 0, 1, 1], [], []>} : vector<16x64xf32>, vector<64x64xf32>, vector<16x64xf32> -> vector<16x64xf32>
    %57 = vector.extract_strided_slice %1 {offsets = [4, 0], sizes = [1, 64], strides = [1, 1]} : vector<14x64xf32> to vector<1x64xf32>
    %58 = vector.broadcast %57 : vector<1x64xf32> to vector<16x64xf32>
    %59 = arith.addf %56, %58 : vector<16x64xf32>
    %60 = arith.addf %0, %59 : vector<16x64xf32>
    %61 = vector.extract_strided_slice %1 {offsets = [2, 0], sizes = [1, 64], strides = [1, 1]} : vector<14x64xf32> to vector<1x64xf32>
    %62 = vector.extract_strided_slice %1 {offsets = [3, 0], sizes = [1, 64], strides = [1, 1]} : vector<14x64xf32> to vector<1x64xf32>
    %cst_31 = arith.constant dense<0.000000e+00> : vector<16xf32>
    %63 = vector.multi_reduction <add>, %60, %cst_31 [1] : vector<16x64xf32> to vector<16xf32>
    %64 = vector.shape_cast %63 : vector<16xf32> to vector<16x1xf32>
    %cst_32 = arith.constant 6.400000e+01 : f32
    %65 = vector.broadcast %cst_32 : f32 to vector<16x1xf32>
    %66 = arith.divf %64, %65 : vector<16x1xf32>
    %67 = vector.broadcast %66 : vector<16x1xf32> to vector<16x64xf32>
    %68 = arith.subf %60, %67 : vector<16x64xf32>
    %69 = vector.broadcast %66 : vector<16x1xf32> to vector<16x64xf32>
    %70 = arith.subf %60, %69 : vector<16x64xf32>
    %71 = arith.mulf %68, %70 : vector<16x64xf32>
    %cst_33 = arith.constant dense<0.000000e+00> : vector<16xf32>
    %72 = vector.multi_reduction <add>, %71, %cst_33 [1] : vector<16x64xf32> to vector<16xf32>
    %73 = vector.shape_cast %72 : vector<16xf32> to vector<16x1xf32>
    %cst_34 = arith.constant 6.400000e+01 : f32
    %74 = vector.broadcast %cst_34 : f32 to vector<16x1xf32>
    %75 = arith.divf %73, %74 : vector<16x1xf32>
    %76 = vector.broadcast %66 : vector<16x1xf32> to vector<16x64xf32>
    %77 = arith.subf %60, %76 : vector<16x64xf32>
    %cst_35 = arith.constant 9.99999974E-6 : f32
    %78 = vector.broadcast %cst_35 : f32 to vector<16x1xf32>
    %79 = arith.addf %75, %78 : vector<16x1xf32>
    %80 = math.rsqrt %79 : vector<16x1xf32>
    %81 = vector.broadcast %80 : vector<16x1xf32> to vector<16x64xf32>
    %82 = arith.mulf %77, %81 : vector<16x64xf32>
    %83 = vector.broadcast %61 : vector<1x64xf32> to vector<16x64xf32>
    %84 = arith.mulf %82, %83 : vector<16x64xf32>
    %85 = vector.broadcast %62 : vector<1x64xf32> to vector<16x64xf32>
    %86 = arith.addf %84, %85 : vector<16x64xf32>
    %c0_36 = arith.constant 0 : index
    %c0_37 = arith.constant 0 : index
    %c0_38 = arith.constant 0 : index
    %87 = vector.load %arg2[%c0_36, %c0_37, %c0_38] : memref<2x64x256xf32, #tpu.memory_space<vmem>>, vector<1x64x256xf32>
    %88 = vector.shape_cast %87 : vector<1x64x256xf32> to vector<64x256xf32>
    %cst_39 = arith.constant dense<0.000000e+00> : vector<16x256xf32>
    %89 = tpu.matmul %86, %88, %cst_39 {dimension_numbers = #tpu.dot_dimension_numbers<[1], [0], [0], [1], [0, 0, 1, 1], [], []>} : vector<16x64xf32>, vector<64x256xf32>, vector<16x256xf32> -> vector<16x256xf32>
    %90 = vector.extract_strided_slice %2 {offsets = [0, 0], sizes = [1, 256], strides = [1, 1]} : vector<2x256xf32> to vector<1x256xf32>
    %91 = vector.broadcast %90 : vector<1x256xf32> to vector<16x256xf32>
    %92 = arith.addf %89, %91 : vector<16x256xf32>
    %cst_40 = arith.constant 0.000000e+00 : f32
    %93 = vector.broadcast %cst_40 : f32 to vector<16x256xf32>
    %94 = arith.maximumf %92, %93 : vector<16x256xf32>
    %c0_41 = arith.constant 0 : index
    %c0_42 = arith.constant 0 : index
    %c0_43 = arith.constant 0 : index
    %95 = vector.load %arg3[%c0_41, %c0_42, %c0_43] : memref<2x256x64xf32, #tpu.memory_space<vmem>>, vector<1x256x64xf32>
    %96 = vector.shape_cast %95 : vector<1x256x64xf32> to vector<256x64xf32>
    %cst_44 = arith.constant dense<0.000000e+00> : vector<16x64xf32>
    %97 = tpu.matmul %94, %96, %cst_44 {dimension_numbers = #tpu.dot_dimension_numbers<[1], [0], [0], [1], [0, 0, 1, 1], [], []>} : vector<16x256xf32>, vector<256x64xf32>, vector<16x64xf32> -> vector<16x64xf32>
    %98 = vector.extract_strided_slice %1 {offsets = [5, 0], sizes = [1, 64], strides = [1, 1]} : vector<14x64xf32> to vector<1x64xf32>
    %99 = vector.broadcast %98 : vector<1x64xf32> to vector<16x64xf32>
    %100 = arith.addf %97, %99 : vector<16x64xf32>
    %101 = arith.addf %60, %100 : vector<16x64xf32>
    %102 = vector.extract_strided_slice %1 {offsets = [6, 0], sizes = [1, 64], strides = [1, 1]} : vector<14x64xf32> to vector<1x64xf32>
    %103 = vector.extract_strided_slice %1 {offsets = [7, 0], sizes = [1, 64], strides = [1, 1]} : vector<14x64xf32> to vector<1x64xf32>
    %cst_45 = arith.constant dense<0.000000e+00> : vector<16xf32>
    %104 = vector.multi_reduction <add>, %101, %cst_45 [1] : vector<16x64xf32> to vector<16xf32>
    %105 = vector.shape_cast %104 : vector<16xf32> to vector<16x1xf32>
    %cst_46 = arith.constant 6.400000e+01 : f32
    %106 = vector.broadcast %cst_46 : f32 to vector<16x1xf32>
    %107 = arith.divf %105, %106 : vector<16x1xf32>
    %108 = vector.broadcast %107 : vector<16x1xf32> to vector<16x64xf32>
    %109 = arith.subf %101, %108 : vector<16x64xf32>
    %110 = vector.broadcast %107 : vector<16x1xf32> to vector<16x64xf32>
    %111 = arith.subf %101, %110 : vector<16x64xf32>
    %112 = arith.mulf %109, %111 : vector<16x64xf32>
    %cst_47 = arith.constant dense<0.000000e+00> : vector<16xf32>
    %113 = vector.multi_reduction <add>, %112, %cst_47 [1] : vector<16x64xf32> to vector<16xf32>
    %114 = vector.shape_cast %113 : vector<16xf32> to vector<16x1xf32>
    %cst_48 = arith.constant 6.400000e+01 : f32
    %115 = vector.broadcast %cst_48 : f32 to vector<16x1xf32>
    %116 = arith.divf %114, %115 : vector<16x1xf32>
    %117 = vector.broadcast %107 : vector<16x1xf32> to vector<16x64xf32>
    %118 = arith.subf %101, %117 : vector<16x64xf32>
    %cst_49 = arith.constant 9.99999974E-6 : f32
    %119 = vector.broadcast %cst_49 : f32 to vector<16x1xf32>
    %120 = arith.addf %116, %119 : vector<16x1xf32>
    %121 = math.rsqrt %120 : vector<16x1xf32>
    %122 = vector.broadcast %121 : vector<16x1xf32> to vector<16x64xf32>
    %123 = arith.mulf %118, %122 : vector<16x64xf32>
    %124 = vector.broadcast %102 : vector<1x64xf32> to vector<16x64xf32>
    %125 = arith.mulf %123, %124 : vector<16x64xf32>
    %126 = vector.broadcast %103 : vector<1x64xf32> to vector<16x64xf32>
    %127 = arith.addf %125, %126 : vector<16x64xf32>
    %128 = tpu.concatenate %127, %127, %127, %127, %127, %127, %127, %127 in 0 : vector<16x64xf32>, vector<16x64xf32>, vector<16x64xf32>, vector<16x64xf32>, vector<16x64xf32>, vector<16x64xf32>, vector<16x64xf32>, vector<16x64xf32> -> vector<128x64xf32>
    %c4 = arith.constant 4 : index
    %c0_50 = arith.constant 0 : index
    %c0_51 = arith.constant 0 : index
    %129 = vector.load %arg1[%c4, %c0_50, %c0_51] : memref<8x64x64xf32, #tpu.memory_space<vmem>>, vector<1x64x64xf32>
    %130 = vector.shape_cast %129 : vector<1x64x64xf32> to vector<64x64xf32>
    %cst_52 = arith.constant dense<0.000000e+00> : vector<16x64xf32>
    %131 = tpu.matmul %127, %130, %cst_52 {dimension_numbers = #tpu.dot_dimension_numbers<[1], [0], [0], [1], [0, 0, 1, 1], [], []>} : vector<16x64xf32>, vector<64x64xf32>, vector<16x64xf32> -> vector<16x64xf32>
    %c5 = arith.constant 5 : index
    %c0_53 = arith.constant 0 : index
    %c0_54 = arith.constant 0 : index
    %132 = vector.load %arg1[%c5, %c0_53, %c0_54] : memref<8x64x64xf32, #tpu.memory_space<vmem>>, vector<1x64x64xf32>
    %133 = vector.shape_cast %132 : vector<1x64x64xf32> to vector<64x64xf32>
    %cst_55 = arith.constant dense<0.000000e+00> : vector<128x64xf32>
    %134 = tpu.matmul %128, %133, %cst_55 {dimension_numbers = #tpu.dot_dimension_numbers<[1], [0], [0], [1], [0, 0, 1, 1], [], []>} : vector<128x64xf32>, vector<64x64xf32>, vector<128x64xf32> -> vector<128x64xf32>
    %135 = arith.mulf %134, %5 : vector<128x64xf32>
    %c6 = arith.constant 6 : index
    %c0_56 = arith.constant 0 : index
    %c0_57 = arith.constant 0 : index
    %136 = vector.load %arg1[%c6, %c0_56, %c0_57] : memref<8x64x64xf32, #tpu.memory_space<vmem>>, vector<1x64x64xf32>
    %137 = vector.shape_cast %136 : vector<1x64x64xf32> to vector<64x64xf32>
    %cst_58 = arith.constant dense<0.000000e+00> : vector<128x64xf32>
    %138 = tpu.matmul %128, %137, %cst_58 {dimension_numbers = #tpu.dot_dimension_numbers<[1], [0], [0], [1], [0, 0, 1, 1], [], []>} : vector<128x64xf32>, vector<64x64xf32>, vector<128x64xf32> -> vector<128x64xf32>
    %139 = arith.mulf %138, %5 : vector<128x64xf32>
    %cst_59 = arith.constant dense<0.000000e+00> : vector<16x128xf32>
    %140 = tpu.matmul %131, %135, %cst_59 {dimension_numbers = #tpu.dot_dimension_numbers<[1], [1], [0], [0], [0, 0, 1, 0], [], []>} : vector<16x64xf32>, vector<128x64xf32>, vector<16x128xf32> -> vector<16x128xf32>
    %141 = arith.addf %140, %3 : vector<16x128xf32>
    %cst_60 = arith.constant dense<0xFF800000> : vector<16xf32>
    %142 = vector.multi_reduction <maximumf>, %141, %cst_60 [1] : vector<16x128xf32> to vector<16xf32>
    %143 = vector.shape_cast %142 : vector<16xf32> to vector<16x1xf32>
    %144 = vector.broadcast %143 : vector<16x1xf32> to vector<16x128xf32>
    %145 = arith.subf %141, %144 : vector<16x128xf32>
    %146 = math.exp %145 : vector<16x128xf32>
    %cst_61 = arith.constant dense<0.000000e+00> : vector<16x128xf32>
    %147 = tpu.matmul %146, %4, %cst_61 {dimension_numbers = #tpu.dot_dimension_numbers<[1], [0], [0], [1], [0, 0, 1, 1], [], []>} : vector<16x128xf32>, vector<128x128xf32>, vector<16x128xf32> -> vector<16x128xf32>
    %148 = arith.divf %146, %147 : vector<16x128xf32>
    %cst_62 = arith.constant dense<0.000000e+00> : vector<16x64xf32>
    %149 = tpu.matmul %148, %139, %cst_62 {dimension_numbers = #tpu.dot_dimension_numbers<[1], [0], [0], [1], [0, 0, 1, 1], [], []>} : vector<16x128xf32>, vector<128x64xf32>, vector<16x64xf32> -> vector<16x64xf32>
    %c7 = arith.constant 7 : index
    %c0_63 = arith.constant 0 : index
    %c0_64 = arith.constant 0 : index
    %150 = vector.load %arg1[%c7, %c0_63, %c0_64] : memref<8x64x64xf32, #tpu.memory_space<vmem>>, vector<1x64x64xf32>
    %151 = vector.shape_cast %150 : vector<1x64x64xf32> to vector<64x64xf32>
    %cst_65 = arith.constant dense<0.000000e+00> : vector<16x64xf32>
    %152 = tpu.matmul %149, %151, %cst_65 {dimension_numbers = #tpu.dot_dimension_numbers<[1], [0], [0], [1], [0, 0, 1, 1], [], []>} : vector<16x64xf32>, vector<64x64xf32>, vector<16x64xf32> -> vector<16x64xf32>
    %153 = vector.extract_strided_slice %1 {offsets = [10, 0], sizes = [1, 64], strides = [1, 1]} : vector<14x64xf32> to vector<1x64xf32>
    %154 = vector.broadcast %153 : vector<1x64xf32> to vector<16x64xf32>
    %155 = arith.addf %152, %154 : vector<16x64xf32>
    %156 = arith.addf %101, %155 : vector<16x64xf32>
    %157 = vector.extract_strided_slice %1 {offsets = [8, 0], sizes = [1, 64], strides = [1, 1]} : vector<14x64xf32> to vector<1x64xf32>
    %158 = vector.extract_strided_slice %1 {offsets = [9, 0], sizes = [1, 64], strides = [1, 1]} : vector<14x64xf32> to vector<1x64xf32>
    %cst_66 = arith.constant dense<0.000000e+00> : vector<16xf32>
    %159 = vector.multi_reduction <add>, %156, %cst_66 [1] : vector<16x64xf32> to vector<16xf32>
    %160 = vector.shape_cast %159 : vector<16xf32> to vector<16x1xf32>
    %cst_67 = arith.constant 6.400000e+01 : f32
    %161 = vector.broadcast %cst_67 : f32 to vector<16x1xf32>
    %162 = arith.divf %160, %161 : vector<16x1xf32>
    %163 = vector.broadcast %162 : vector<16x1xf32> to vector<16x64xf32>
    %164 = arith.subf %156, %163 : vector<16x64xf32>
    %165 = vector.broadcast %162 : vector<16x1xf32> to vector<16x64xf32>
    %166 = arith.subf %156, %165 : vector<16x64xf32>
    %167 = arith.mulf %164, %166 : vector<16x64xf32>
    %cst_68 = arith.constant dense<0.000000e+00> : vector<16xf32>
    %168 = vector.multi_reduction <add>, %167, %cst_68 [1] : vector<16x64xf32> to vector<16xf32>
    %169 = vector.shape_cast %168 : vector<16xf32> to vector<16x1xf32>
    %cst_69 = arith.constant 6.400000e+01 : f32
    %170 = vector.broadcast %cst_69 : f32 to vector<16x1xf32>
    %171 = arith.divf %169, %170 : vector<16x1xf32>
    %172 = vector.broadcast %162 : vector<16x1xf32> to vector<16x64xf32>
    %173 = arith.subf %156, %172 : vector<16x64xf32>
    %cst_70 = arith.constant 9.99999974E-6 : f32
    %174 = vector.broadcast %cst_70 : f32 to vector<16x1xf32>
    %175 = arith.addf %171, %174 : vector<16x1xf32>
    %176 = math.rsqrt %175 : vector<16x1xf32>
    %177 = vector.broadcast %176 : vector<16x1xf32> to vector<16x64xf32>
    %178 = arith.mulf %173, %177 : vector<16x64xf32>
    %179 = vector.broadcast %157 : vector<1x64xf32> to vector<16x64xf32>
    %180 = arith.mulf %178, %179 : vector<16x64xf32>
    %181 = vector.broadcast %158 : vector<1x64xf32> to vector<16x64xf32>
    %182 = arith.addf %180, %181 : vector<16x64xf32>
    %c1_71 = arith.constant 1 : index
    %c0_72 = arith.constant 0 : index
    %c0_73 = arith.constant 0 : index
    %183 = vector.load %arg2[%c1_71, %c0_72, %c0_73] : memref<2x64x256xf32, #tpu.memory_space<vmem>>, vector<1x64x256xf32>
    %184 = vector.shape_cast %183 : vector<1x64x256xf32> to vector<64x256xf32>
    %cst_74 = arith.constant dense<0.000000e+00> : vector<16x256xf32>
    %185 = tpu.matmul %182, %184, %cst_74 {dimension_numbers = #tpu.dot_dimension_numbers<[1], [0], [0], [1], [0, 0, 1, 1], [], []>} : vector<16x64xf32>, vector<64x256xf32>, vector<16x256xf32> -> vector<16x256xf32>
    %186 = vector.extract_strided_slice %2 {offsets = [1, 0], sizes = [1, 256], strides = [1, 1]} : vector<2x256xf32> to vector<1x256xf32>
    %187 = vector.broadcast %186 : vector<1x256xf32> to vector<16x256xf32>
    %188 = arith.addf %185, %187 : vector<16x256xf32>
    %cst_75 = arith.constant 0.000000e+00 : f32
    %189 = vector.broadcast %cst_75 : f32 to vector<16x256xf32>
    %190 = arith.maximumf %188, %189 : vector<16x256xf32>
    %c1_76 = arith.constant 1 : index
    %c0_77 = arith.constant 0 : index
    %c0_78 = arith.constant 0 : index
    %191 = vector.load %arg3[%c1_76, %c0_77, %c0_78] : memref<2x256x64xf32, #tpu.memory_space<vmem>>, vector<1x256x64xf32>
    %192 = vector.shape_cast %191 : vector<1x256x64xf32> to vector<256x64xf32>
    %cst_79 = arith.constant dense<0.000000e+00> : vector<16x64xf32>
    %193 = tpu.matmul %190, %192, %cst_79 {dimension_numbers = #tpu.dot_dimension_numbers<[1], [0], [0], [1], [0, 0, 1, 1], [], []>} : vector<16x256xf32>, vector<256x64xf32>, vector<16x64xf32> -> vector<16x64xf32>
    %194 = vector.extract_strided_slice %1 {offsets = [11, 0], sizes = [1, 64], strides = [1, 1]} : vector<14x64xf32> to vector<1x64xf32>
    %195 = vector.broadcast %194 : vector<1x64xf32> to vector<16x64xf32>
    %196 = arith.addf %193, %195 : vector<16x64xf32>
    %197 = arith.addf %156, %196 : vector<16x64xf32>
    %198 = vector.extract_strided_slice %1 {offsets = [12, 0], sizes = [1, 64], strides = [1, 1]} : vector<14x64xf32> to vector<1x64xf32>
    %199 = vector.extract_strided_slice %1 {offsets = [13, 0], sizes = [1, 64], strides = [1, 1]} : vector<14x64xf32> to vector<1x64xf32>
    %cst_80 = arith.constant dense<0.000000e+00> : vector<16xf32>
    %200 = vector.multi_reduction <add>, %197, %cst_80 [1] : vector<16x64xf32> to vector<16xf32>
    %201 = vector.shape_cast %200 : vector<16xf32> to vector<16x1xf32>
    %cst_81 = arith.constant 6.400000e+01 : f32
    %202 = vector.broadcast %cst_81 : f32 to vector<16x1xf32>
    %203 = arith.divf %201, %202 : vector<16x1xf32>
    %204 = vector.broadcast %203 : vector<16x1xf32> to vector<16x64xf32>
    %205 = arith.subf %197, %204 : vector<16x64xf32>
    %206 = vector.broadcast %203 : vector<16x1xf32> to vector<16x64xf32>
    %207 = arith.subf %197, %206 : vector<16x64xf32>
    %208 = arith.mulf %205, %207 : vector<16x64xf32>
    %cst_82 = arith.constant dense<0.000000e+00> : vector<16xf32>
    %209 = vector.multi_reduction <add>, %208, %cst_82 [1] : vector<16x64xf32> to vector<16xf32>
    %210 = vector.shape_cast %209 : vector<16xf32> to vector<16x1xf32>
    %cst_83 = arith.constant 6.400000e+01 : f32
    %211 = vector.broadcast %cst_83 : f32 to vector<16x1xf32>
    %212 = arith.divf %210, %211 : vector<16x1xf32>
    %213 = vector.broadcast %203 : vector<16x1xf32> to vector<16x64xf32>
    %214 = arith.subf %197, %213 : vector<16x64xf32>
    %cst_84 = arith.constant 9.99999974E-6 : f32
    %215 = vector.broadcast %cst_84 : f32 to vector<16x1xf32>
    %216 = arith.addf %212, %215 : vector<16x1xf32>
    %217 = math.rsqrt %216 : vector<16x1xf32>
    %218 = vector.broadcast %217 : vector<16x1xf32> to vector<16x64xf32>
    %219 = arith.mulf %214, %218 : vector<16x64xf32>
    %220 = vector.broadcast %198 : vector<1x64xf32> to vector<16x64xf32>
    %221 = arith.mulf %219, %220 : vector<16x64xf32>
    %222 = vector.broadcast %199 : vector<1x64xf32> to vector<16x64xf32>
    %223 = arith.addf %221, %222 : vector<16x64xf32>
    %c0_85 = arith.constant 0 : index
    %c0_86 = arith.constant 0 : index
    %224 = vector.load %arg6[%c0_85, %c0_86] : memref<65x128xf32, #tpu.memory_space<vmem>>, vector<64x128xf32>
    %cst_87 = arith.constant dense<0.000000e+00> : vector<16x128xf32>
    %225 = tpu.matmul %223, %224, %cst_87 {dimension_numbers = #tpu.dot_dimension_numbers<[1], [0], [0], [1], [0, 0, 1, 1], [], []>} : vector<16x64xf32>, vector<64x128xf32>, vector<16x128xf32> -> vector<16x128xf32>
    %c64 = arith.constant 64 : index
    %c0_88 = arith.constant 0 : index
    %226 = vector.load %arg6[%c64, %c0_88] : memref<65x128xf32, #tpu.memory_space<vmem>>, vector<1x128xf32>
    %227 = vector.broadcast %226 : vector<1x128xf32> to vector<16x128xf32>
    %228 = arith.addf %225, %227 : vector<16x128xf32>
    %229 = vector.extract_strided_slice %228 {offsets = [0, 0], sizes = [8, 128], strides = [1, 1]} : vector<16x128xf32> to vector<8x128xf32>
    %230 = vector.extract_strided_slice %228 {offsets = [8, 0], sizes = [8, 128], strides = [1, 1]} : vector<16x128xf32> to vector<8x128xf32>
    %231 = arith.maximumf %229, %230 : vector<8x128xf32>
    %232 = vector.extract_strided_slice %228 {offsets = [0, 0], sizes = [8, 128], strides = [1, 1]} : vector<16x128xf32> to vector<8x128xf32>
    %233 = arith.subf %232, %231 : vector<8x128xf32>
    %234 = math.exp %233 : vector<8x128xf32>
    %235 = vector.extract_strided_slice %228 {offsets = [8, 0], sizes = [8, 128], strides = [1, 1]} : vector<16x128xf32> to vector<8x128xf32>
    %236 = arith.subf %235, %231 : vector<8x128xf32>
    %237 = math.exp %236 : vector<8x128xf32>
    %238 = arith.addf %234, %237 : vector<8x128xf32>
    %cst_89 = arith.constant 1.000000e+00 : f32
    %239 = vector.broadcast %cst_89 : f32 to vector<8x128xf32>
    %240 = arith.divf %239, %238 : vector<8x128xf32>
    %241 = arith.mulf %234, %240 : vector<8x128xf32>
    %c0_90 = arith.constant 0 : index
    %c0_91 = arith.constant 0 : index
    %242 = vector.load %arg9[%c0_90, %c0_91] : memref<16x128xf32, #tpu.memory_space<vmem>>, vector<8x128xf32>
    tpu.vector_store %arg9[%c0_90, %c0_91], %241 {strides = array<i32>} : memref<16x128xf32, #tpu.memory_space<vmem>>, vector<8x128xf32>,
    %243 = arith.mulf %237, %240 : vector<8x128xf32>
    %c8 = arith.constant 8 : index
    %c0_92 = arith.constant 0 : index
    %244 = vector.load %arg9[%c8, %c0_92] : memref<16x128xf32, #tpu.memory_space<vmem>>, vector<8x128xf32>
    tpu.vector_store %arg9[%c8, %c0_92], %243 {strides = array<i32>} : memref<16x128xf32, #tpu.memory_space<vmem>>, vector<8x128xf32>,
    return
  }
}

</mosaic_0001>

<bundles_post_ra>
// kernel: tpu_custom_call.1
= control target key start
LH: loop header
LB: loop body
LE: loop exit
PB: predicated region body
PF: predicated region fallthrough
CT: control target
= control target key end

     0   :  { %14 = vsyncpa [#allocation3], 0  ;;  %s5028_s0 = inlined_call_operand.vmem [shape: f32[16,64], index: 0, kind: input, shape index: {}]   ;;  %s5029_s1 = inlined_call_operand.vmem [shape: f32[8,64,64], index: 1, kind: input, shape index: {}]   ;;  %s5030_s2 = inlined_call_operand.vmem [shape: f32[2,64,256], index: 2, kind: input, shape index: {}]   ;;  %s5031_s3 = inlined_call_operand.vmem [shape: f32[2,256,64], index: 3, kind: input, shape index: {}]   ;;  %s5032_s4 = inlined_call_operand.vmem [shape: f32[14,64], index: 4, kind: input, shape index: {}]   ;;  %s5033_s5 = inlined_call_operand.vmem [shape: f32[2,256], index: 5, kind: input, shape index: {}]   ;;  %s5034_s6 = inlined_call_operand.hbm [shape: f32[65,128], index: 6, kind: input, shape index: {}]   ;;  %s5035_s7 = inlined_call_operand.vmem [shape: f32[144,128], index: 7, kind: input, shape index: {}]   ;;  %s5036_s8 = inlined_call_operand.vmem [shape: f32[128,64], index: 8, kind: input, shape index: {}]   ;;  %s5037_s9 = inlined_call_operand.hbm [shape: f32[16,128], index: 9, kind: output, shape index: {}]  }
   0x1   :  { %15 = vsyncpa [#allocation4], 0  ;;  %s3652_s30 = smov [#allocation2]  }
   0x2   :  { %s33_s10 = sshll.u32 %s3652_s30, 4  ;;  %s34_s10 = int_to_ptr.vmem [resolvable:$true] %s33_s10 }
   0x3   :  { %s3616_s11 = scalar_lea.vmem %s34_s10, 1152  ;;  %p3621_p1 = scmp.lt.s32.totalorder %s34_s10, %s34_s10 }
   0x4   :  { %p3617_p0 = scmp.ne.s32.totalorder %s34_s10, %s3616_s11  ;;  %p3622_p2 = scmp.lt.s32.totalorder %s3616_s11, %s3616_s11 }
   0x6   :  { %p3623_p3 = por %p3622_p2, %p3621_p1 }
   0x8   :  { %p3624_p4 = pnand %p3623_p3, %p3617_p0 }
   0xa   :  { %3627 = shalt.err (!%p3624_p4)
}
   0xb   :  { %s3653_s12 = smov 128   ;;  %s3654_s13 = smov 8  }
   0xc   :  { %39 = dma.hbm_to_vmem [thread:$0]  %s5034_s6, 1152, %s34_s10, [#allocation3], %s3653_s12, %s3653_s12, %s3654_s13  }
   0xd   :  { %3648 = dma.done.wait [#allocation3], 1152  }
   0xe   :  { %3649 = vsyncadd [#allocation3], 4294966144  ;;  %vm86_vm0 = vcmask 523264   ;;  %v3716_v0 = vld [vmem:[%s5028_s0] sm:$0xff]  ;;  %v3721_v1 = vld [vmem:[%s5028_s0 + $0x8] sm:$0xff]  ;;  %v114_v36 = vlaneseq }
   0xf   :  { %v87_v2 = vsel %vm86_vm0, %v3716_v0, 0.0  ;;  %v90_v3 = vsel %vm86_vm0, %v3721_v1, 0.0  ;;  %v133_v14 = vld [vmem:[%s5029_s1 + $0x38] sm:$0xff]  ;;  %v132_v16 = vld [vmem:[%s5029_s1 + $0x30] sm:$0xff]  ;;  %v131_v18 = vld [vmem:[%s5029_s1 + $0x28] sm:$0xff] }
  0x10   :  { %88 = vadd.xlane.f32.xlu0 %v87_v2  ;;  %3060 = vmatprep.subr.mxu1 %v133_v14  ;;  %v2544_v15 = vld [vmem:[%s5029_s1 + $0xb8] sm:$0xff]  ;;  %v2543_v17 = vld [vmem:[%s5029_s1 + $0xb0] sm:$0xff]  ;;  %v2542_v19 = vld [vmem:[%s5029_s1 + $0xa8] sm:$0xff]  ;;  %v3793_v39 = vshrl.u32 %v114_v36, 7 }
  0x11   :  { %3061 = vmatpush3.msra.mxu1 %v133_v14  ;;  %3119 = vmatprep.subr.mxu0 %v2544_v15  ;;  %v130_v20 = vld [vmem:[%s5029_s1 + $0x20] sm:$0xff]  ;;  %v129_v22 = vld [vmem:[%s5029_s1 + $0x18] sm:$0xff]  ;;  %v128_v24 = vld [vmem:[%s5029_s1 + $0x10] sm:$0xff] }
  0x12   :  { %3062 = vmatprep.subr.mxu1 %v132_v16  ;;  %3120 = vmatpush3.msra.mxu0 %v2544_v15  ;;  %v2541_v21 = vld [vmem:[%s5029_s1 + $0xa0] sm:$0xff]  ;;  %v2540_v23 = vld [vmem:[%s5029_s1 + $0x98] sm:$0xff]  ;;  %v2539_v25 = vld [vmem:[%s5029_s1 + $0x90] sm:$0xff]  ;;  %v3796_v40 = vsub.s32 0, %v3793_v39  ;;  %v3804_v42 = vsub.s32 1, %v3793_v39 }
  0x13   :  { %3063 = vmatpush3.msra.mxu1 %v132_v16  ;;  %3121 = vmatprep.subr.mxu0 %v2543_v17  ;;  %v127_v26 = vld [vmem:[%s5029_s1 + $0x8] sm:$0xff]  ;;  %v126_v28 = vld [vmem:[%s5029_s1] sm:$0xff]  ;;  %v2520_v30 = vld [vmem:[%s5029_s1 + $0x78] sm:$0xff] }
  0x14   :  { %91 = vadd.xlane.f32.xlu0 %v90_v3  ;;  %3064 = vmatprep.subr.mxu1 %v131_v18  ;;  %v2538_v27 = vld [vmem:[%s5029_s1 + $0x88] sm:$0xff]  ;;  %v2537_v29 = vld [vmem:[%s5029_s1 + $0x80] sm:$0xff]  ;;  %v2519_v53 = vld [vmem:[%s5029_s1 + $0x70] sm:$0xff] }
  0x15   :  { %3122 = vmatpush3.msra.mxu0 %v2543_v17  ;;  %3065 = vmatpush3.msra.mxu1 %v131_v18  ;;  %v69_v31 = vld [vmem:[%s5035_s7 + $0x88] sm:$0xff]  ;;  %v3801_v41 = vld [vmem:[%s5032_s4] sm:$0xff]  ;;  %v2516_v56 = vld [vmem:[%s5029_s1 + $0x58] sm:$0xff] }
  0x16   :  { %3123 = vmatprep.subr.mxu0 %v2542_v19  ;;  %3066 = vmatprep.subr.mxu1 %v130_v20  ;;  %v117_v43 = vrot.slane %v3801_v41, %v3796_v40  ;;  %v123_v45 = vrot.slane %v3801_v41, %v3804_v42  ;;  %v2518_v54 = vld [vmem:[%s5029_s1 + $0x68] sm:$0xff]  ;;  %v2517_v55 = vld [vmem:[%s5029_s1 + $0x60] sm:$0xff]  ;;  %v2515_v57 = vld [vmem:[%s5029_s1 + $0x50] sm:$0xff] }
  0x17   :  { %3124 = vmatpush3.msra.mxu0 %v2542_v19  ;;  %3067 = vmatpush3.msra.mxu1 %v130_v20  ;;  %v2514_v58 = vld [vmem:[%s5029_s1 + $0x48] sm:$0xff]  ;;  %v2513_v59 = vld [vmem:[%s5029_s1 + $0x40] sm:$0xff]  ;;  %v67_v61 = vld [vmem:[%s5035_s7 + $0x78] sm:$0xff] }
  0x18   :  { %3125 = vmatprep.subr.mxu0 %v2541_v21  ;;  %3068 = vmatprep.subr.mxu1 %v129_v22  ;;  %v68_v60 = vld [vmem:[%s5035_s7 + $0x80] sm:$0xff]  ;;  %v66_v62 = vld [vmem:[%s5035_s7 + $0x70] sm:$0xff]  ;;  %v65_v63 = vld [vmem:[%s5035_s7 + $0x68] sm:$0xff] }
  0x19   :  { %3126 = vmatpush3.msra.mxu0 %v2541_v21  ;;  %3069 = vmatpush3.msra.mxu1 %v129_v22  ;;  %v64_v2 = vld [vmem:[%s5035_s7 + $0x60] sm:$0xff]  ;;  %v63_v3 = vld [vmem:[%s5035_s7 + $0x58] sm:$0xff] }
  0x1a   :  { %3127 = vmatprep.subr.mxu0 %v2540_v23  ;;  %3070 = vmatprep.subr.mxu1 %v128_v24 }
  0x1b   :  { %3128 = vmatpush3.msra.mxu0 %v2540_v23  ;;  %3071 = vmatpush3.msra.mxu1 %v128_v24 }
  0x1c   :  { %3129 = vmatprep.subr.mxu0 %v2539_v25  ;;  %3072 = vmatprep.subr.mxu1 %v127_v26 }
  0x1d   :  { %3130 = vmatpush3.msra.mxu0 %v2539_v25  ;;  %3073 = vmatpush3.msra.mxu1 %v127_v26 }
  0x1e   :  { %3131 = vmatprep.subr.mxu0 %v2538_v27  ;;  %3074 = vmatprep.subr.mxu1 %v126_v28 }
  0x1f   :  { %3132 = vmatpush3.msra.mxu0 %v2538_v27  ;;  %3075 = vmatpush3.msra.mxu1 %v126_v28 }
  0x20   :  { %3133 = vmatprep.subr.mxu0 %v2537_v29  ;;  %3079 = vmatprep.subr.mxu1 %v2520_v30 }
  0x21   :  { %3134 = vmatpush3.msra.mxu0 %v2537_v29 }
  0x22   :  { %3194 = vmatprep.subr.mxu0 %v69_v31 }
  0x99   :  { %v89_v4 = vpop.xlane.xlu0 %88 }
  0x9a   :  { %v94_v5 = vmul.f32 0.015625, %v89_v4  ;;  %v62_v4 = vld [vmem:[%s5035_s7 + $0x50] sm:$0xff] }
  0x9c   :  { %v3728_v6 = vsub.f32 %v3716_v0, %v94_v5  ;;  %v61_v5 = vld [vmem:[%s5035_s7 + $0x48] sm:$0xff] }
  0x9d   :  { %v92_v7 = vpop.xlane.xlu0 %91 }
  0x9e   :  { %v95_v8 = vmul.f32 0.015625, %v92_v7  ;;  %v98_v9 = vmul.f32 %v3728_v6, %v3728_v6  ;;  %v59_v7 = vld [vmem:[%s5035_s7 + $0x38] sm:$0xff] }
  0xa0   :  { %v3733_v10 = vsub.f32 %v3721_v1, %v95_v8  ;;  %v100_v11 = vsel %vm86_vm0, %v98_v9, 0.0  ;;  %v58_v8 = vld [vmem:[%s5035_s7 + $0x30] sm:$0xff]  ;;  %v57_v9 = vld [vmem:[%s5035_s7 + $0x28] sm:$0xff] }
  0xa1   :  { %101 = vadd.xlane.f32.xlu1 %v100_v11  ;;  %v55_v11 = vld [vmem:[%s5035_s7 + $0x18] sm:$0xff] }
  0xa2   :  { %v99_v12 = vmul.f32 %v3733_v10, %v3733_v10 }
  0xa4   :  { %v103_v13 = vsel %vm86_vm0, %v99_v12, 0.0  ;;  %v54_v12 = vld [vmem:[%s5035_s7 + $0x10] sm:$0xff] }
  0xa5   :  { %104 = vadd.xlane.f32.xlu1 %v103_v13 }
 0x12a   :  { %v102_v32 = vpop.xlane.xlu1 %101 }
 0x12b   :  { %v106_v33 = vmul.f32 0.015625, %v102_v32 }
 0x12d   :  { %v108_v34 = vadd.f32 1e-05, %v106_v33 }
 0x12e   :  { %v105_v35 = vpop.xlane.xlu1 %104 }
 0x12f   :  { %3530 = vrsqrt.f32 %v108_v34  ;;  %v107_v37 = vmul.f32 0.015625, %v105_v35  ;;  %v85_v35 = vld [vmem:[%s5036_s8 + $0x78] sm:$0xff] }
 0x131   :  { %v109_v38 = vadd.f32 1e-05, %v107_v37 }
 0x133   :  { %3532 = vrsqrt.f32 %v109_v38 }
 0x13c   :  { %v3531_v44 = vpop.eup %3530 }
 0x13d   :  { %v112_v46 = vmul.f32 %v3531_v44, %v3728_v6  ;;  %v60_v6 = vld [vmem:[%s5035_s7 + $0x40] sm:$0xff] }
 0x13f   :  { %v118_v47 = vmul.f32 %v117_v43, %v112_v46 }
 0x140   :  { %v3533_v48 = vpop.eup %3532 }
 0x141   :  { %v124_v49 = vadd.f32 %v123_v45, %v118_v47  ;;  %v113_v50 = vmul.f32 %v3533_v48, %v3733_v10  ;;  %v56_v10 = vld [vmem:[%s5035_s7 + $0x20] sm:$0xff] }
 0x143   :  { %v119_v51 = vmul.f32 %v117_v43, %v113_v50  ;;  %3076 = vmatprep.mubr.msk.f32.mxu1 %vm86_vm0, %v124_v49  ;;  %3135 = vmatprep.mubr.msk.f32.mxu0 %vm86_vm0, %v124_v49 }
 0x145   :  { %v125_v52 = vadd.f32 %v123_v45, %v119_v51 }
 0x147   :  { %3077 = vmatmul.mubr.msk.f32.vlgmr.msra.gmra.mxu1 %vm86_vm0, %v125_v52  ;;  %3136 = vmatmul.mubr.msk.f32.vlgmr.msra.gmra.mxu0 %vm86_vm0, %v125_v52 }
 0x148   :  { %3080 = vmatpush3.msra.mxu1 %v2520_v30  ;;  %3095 = vmatprep.mubr.msk.f32.mxu1 %vm86_vm0, %v124_v49 }
 0x149   :  { %3081 = vmatprep.subr.mxu1 %v2519_v53  ;;  %3138 = vmatprep.mubr.msk.f32.mxu0 %vm86_vm0, %v124_v49 }
 0x14a   :  { %3082 = vmatpush3.msra.mxu1 %v2519_v53  ;;  %3195 = vmatpush3.msra.mxu0 %v69_v31 }
 0x14b   :  { %3083 = vmatprep.subr.mxu1 %v2518_v54  ;;  %3139 = vmatmul.mubr.msk.f32.gmra.mxu0 %vm86_vm0, %v125_v52 }
 0x14c   :  { %3084 = vmatpush3.msra.mxu1 %v2518_v54  ;;  %3141 = vmatprep.mubr.msk.f32.mxu0 %vm86_vm0, %v124_v49 }
 0x14d   :  { %3085 = vmatprep.subr.mxu1 %v2517_v55  ;;  %3196 = vmatprep.subr.mxu0 %v68_v60 }
 0x14e   :  { %3086 = vmatpush3.msra.mxu1 %v2517_v55  ;;  %3197 = vmatpush3.msra.mxu0 %v68_v60  ;;  %v3969_v55 = vld [vmem:[%s5036_s8 + $0x68] sm:$0xff] }
 0x14f   :  { %3087 = vmatprep.subr.mxu1 %v2516_v56  ;;  %3142 = vmatmul.mubr.msk.f32.gmra.mxu0 %vm86_vm0, %v125_v52 }
 0x150   :  { %3088 = vmatpush3.msra.mxu1 %v2516_v56  ;;  %3144 = vmatprep.mubr.msk.f32.mxu0 %vm86_vm0, %v124_v49 }
 0x151   :  { %3089 = vmatprep.subr.mxu1 %v2515_v57  ;;  %3198 = vmatprep.subr.mxu0 %v67_v61 }
 0x152   :  { %3090 = vmatpush3.msra.mxu1 %v2515_v57  ;;  %3199 = vmatpush3.msra.mxu0 %v67_v61  ;;  %v3977_v57 = vld [vmem:[%s5036_s8 + $0x60] sm:$0xff]  ;;  %v3993_v61 = vld [vmem:[%s5036_s8 + $0x50] sm:$0xff] }
 0x153   :  { %3091 = vmatprep.subr.mxu1 %v2514_v58  ;;  %3145 = vmatmul.mubr.msk.f32.gmra.mxu0 %vm86_vm0, %v125_v52 }
 0x154   :  { %3092 = vmatpush3.msra.mxu1 %v2514_v58  ;;  %3147 = vmatprep.mubr.msk.f32.mxu0 %vm86_vm0, %v124_v49 }
 0x155   :  { %3093 = vmatprep.subr.mxu1 %v2513_v59  ;;  %3200 = vmatprep.subr.mxu0 %v66_v62 }
 0x156   :  { %3094 = vmatpush3.msra.mxu1 %v2513_v59  ;;  %3201 = vmatpush3.msra.mxu0 %v66_v62  ;;  %v3985_v59 = vld [vmem:[%s5036_s8 + $0x58] sm:$0xff] }
 0x157   :  { %3096 = vmatmul.mubr.msk.f32.vlgmr.msra.gmra.mxu1 %vm86_vm0, %v125_v52  ;;  %3148 = vmatmul.mubr.msk.f32.gmra.mxu0 %vm86_vm0, %v125_v52 }
 0x158   :  { %3098 = vmatprep.mubr.msk.f32.mxu1 %vm86_vm0, %v124_v49  ;;  %3150 = vmatprep.mubr.msk.f32.mxu0 %vm86_vm0, %v124_v49 }
 0x159   :  { %3202 = vmatprep.subr.mxu0 %v65_v63 }
 0x15a   :  { %3203 = vmatpush3.msra.mxu0 %v65_v63  ;;  %v4001_v63 = vld [vmem:[%s5036_s8 + $0x48] sm:$0xff] }
 0x15b   :  { %3099 = vmatmul.mubr.msk.f32.gmra.mxu1 %vm86_vm0, %v125_v52  ;;  %3151 = vmatmul.mubr.msk.f32.gmra.mxu0 %vm86_vm0, %v125_v52 }
 0x15c   :  { %3101 = vmatprep.mubr.msk.f32.mxu1 %vm86_vm0, %v124_v49  ;;  %3153 = vmatprep.mubr.msk.f32.mxu0 %vm86_vm0, %v124_v49 }
 0x15d   :  { %3204 = vmatprep.subr.mxu0 %v64_v2 }
 0x15e   :  { %3205 = vmatpush3.msra.mxu0 %v64_v2 }
 0x15f   :  { %3102 = vmatmul.mubr.msk.f32.gmra.mxu1 %vm86_vm0, %v125_v52  ;;  %3154 = vmatmul.mubr.msk.f32.gmra.mxu0 %vm86_vm0, %v125_v52 }
 0x160   :  { %3104 = vmatprep.mubr.msk.f32.mxu1 %vm86_vm0, %v124_v49  ;;  %3156 = vmatprep.mubr.msk.f32.mxu0 %vm86_vm0, %v124_v49 }
 0x161   :  { %3206 = vmatprep.subr.mxu0 %v63_v3 }
 0x162   :  { %3207 = vmatpush3.msra.mxu0 %v63_v3  ;;  %v4009_v3 = vld [vmem:[%s5036_s8 + $0x40] sm:$0xff] }
 0x163   :  { %3105 = vmatmul.mubr.msk.f32.gmra.mxu1 %vm86_vm0, %v125_v52  ;;  %3157 = vmatmul.mubr.msk.f32.gmra.mxu0 %vm86_vm0, %v125_v52 }
 0x164   :  { %3107 = vmatprep.mubr.msk.f32.mxu1 %vm86_vm0, %v124_v49  ;;  %3208 = vmatprep.subr.mxu0 %v62_v4 }
 0x165   :  { %3209 = vmatpush3.msra.mxu0 %v62_v4 }
 0x166   :  { %3210 = vmatprep.subr.mxu0 %v61_v5 }
 0x167   :  { %3108 = vmatmul.mubr.msk.f32.gmra.mxu1 %vm86_vm0, %v125_v52  ;;  %3211 = vmatpush3.msra.mxu0 %v61_v5  ;;  %v4017_v5 = vld [vmem:[%s5036_s8 + $0x38] sm:$0xff] }
 0x168   :  { %3110 = vmatprep.mubr.msk.f32.mxu1 %vm86_vm0, %v124_v49  ;;  %3212 = vmatprep.subr.mxu0 %v60_v6 }
 0x169   :  { %3213 = vmatpush3.msra.mxu0 %v60_v6 }
 0x16a   :  { %3214 = vmatprep.subr.mxu0 %v59_v7 }
 0x16b   :  { %3111 = vmatmul.mubr.msk.f32.gmra.mxu1 %vm86_vm0, %v125_v52  ;;  %3215 = vmatpush3.msra.mxu0 %v59_v7  ;;  %v4025_v7 = vld [vmem:[%s5036_s8 + $0x30] sm:$0xff] }
 0x16c   :  { %3113 = vmatprep.mubr.msk.f32.mxu1 %vm86_vm0, %v124_v49  ;;  %3216 = vmatprep.subr.mxu0 %v58_v8 }
 0x16d   :  { %3217 = vmatpush3.msra.mxu0 %v58_v8 }
 0x16e   :  { %3218 = vmatprep.subr.mxu0 %v57_v9 }
 0x16f   :  { %3114 = vmatmul.mubr.msk.f32.gmra.mxu1 %vm86_vm0, %v125_v52  ;;  %3219 = vmatpush3.msra.mxu0 %v57_v9  ;;  %v4033_v9 = vld [vmem:[%s5036_s8 + $0x28] sm:$0xff] }
 0x170   :  { %3116 = vmatprep.mubr.msk.f32.mxu1 %vm86_vm0, %v124_v49  ;;  %3220 = vmatprep.subr.mxu0 %v56_v10 }
 0x171   :  { %3221 = vmatpush3.msra.mxu0 %v56_v10 }
 0x172   :  { %3222 = vmatprep.subr.mxu0 %v55_v11 }
 0x173   :  { %3117 = vmatmul.mubr.msk.f32.gmra.mxu1 %vm86_vm0, %v125_v52  ;;  %3223 = vmatpush3.msra.mxu0 %v55_v11  ;;  %v3960_v52 = vld [vmem:[%s5036_s8 + $0x70] sm:$0xff]  ;;  %v4041_v11 = vld [vmem:[%s5036_s8 + $0x20] sm:$0xff] }
 0x174   :  { %3224 = vmatprep.subr.mxu0 %v54_v12 }
 0x175   :  { %3225 = vmatpush3.msra.mxu0 %v54_v12 }
 0x207   :  { %v3912_v13 = vpop.f32.mrf.mxu1  ;;  %v3914_v14 = vpop.f32.mrf.mxu0 }
 0x209   :  { %v206_v15 = vpop.f32.mrf.mxu1  ;;  %v3916_v16 = vpop.f32.mrf.mxu0 }
 0x20a   :  { %3191 = vmatprep.mubr.msk.f32.mxu1 %vm86_vm0, %v206_v15  ;;  %v4049_v15 = vld [vmem:[%s5036_s8 + $0x18] sm:$0xff] }
 0x20b   :  { %v3919_v17 = vpop.f32.mrf.mxu0 }
 0x20d   :  { %v3921_v18 = vpop.f32.mrf.mxu0 }
 0x20f   :  { %v3923_v19 = vpop.f32.mrf.mxu0 }
 0x211   :  { %v3925_v20 = vpop.f32.mrf.mxu0 }
 0x213   :  { %v3927_v21 = vpop.f32.mrf.mxu0 }
 0x215   :  { %v3929_v22 = vpop.f32.mrf.mxu0 }
 0x217   :  { %v3931_v23 = vpop.f32.mrf.mxu1  ;;  %v3933_v24 = vpop.f32.mrf.mxu0 }
 0x219   :  { %v3935_v25 = vpop.f32.mrf.mxu1  ;;  %v3937_v26 = vpop.f32.mrf.mxu0 }
 0x21b   :  { %v3939_v27 = vpop.f32.mrf.mxu1  ;;  %v3941_v28 = vpop.f32.mrf.mxu0 }
 0x21d   :  { %v3943_v29 = vpop.f32.mrf.mxu1  ;;  %v3945_v30 = vpop.f32.mrf.mxu0 }
 0x21f   :  { %v3103_v31 = vpop.f32.mrf.mxu1  ;;  %v3947_v32 = vpop.f32.mrf.mxu0 }
 0x220   :  { %v374_v10 = vmul.f32 %v3103_v31, %v4033_v9  ;;  %v372_v31 = vmul.f32 %v3939_v27, %v4049_v15  ;;  %v4067_v27 = vld [vmem:[%s5036_s8 + $0x8] sm:$0xff] }
 0x221   :  { %v310_v33 = vpop.f32.mrf.mxu1  ;;  %v3949_v34 = vpop.f32.mrf.mxu0 }
 0x222   :  { %v373_v12 = vmul.f32 %v310_v33, %v4041_v11  ;;  %v4058_v33 = vld [vmem:[%s5036_s8 + $0x10] sm:$0xff] }
 0x223   :  { %v3106_v36 = vpop.f32.mrf.mxu1  ;;  %v3158_v37 = vpop.f32.mrf.mxu0 }
 0x224   :  { %v3954_v38 = vmul.f32 %v3158_v37, %v85_v35  ;;  %v376_v6 = vmul.f32 %v3106_v36, %v4017_v5  ;;  %v370_v36 = vmul.f32 %v3931_v23, %v4067_v27  ;;  %v53_v23 = vld [vmem:[%s5035_s7 + $0x8] sm:$0xff] }
 0x225   :  { %v320_v43 = vpop.f32.mrf.mxu1 }
 0x226   :  { %3229 = vmatprep.subr.mxu0 %v3954_v38  ;;  %v375_v8 = vmul.f32 %v320_v43, %v4025_v7 }
 0x227   :  { %v3109_v44 = vpop.f32.mrf.mxu1 }
 0x228   :  { %v378_v2 = vmul.f32 %v3109_v44, %v4001_v63  ;;  %v52_v44 = vld [vmem:[%s5035_s7] sm:$0xff] }
 0x229   :  { %v330_v45 = vpop.f32.mrf.mxu1 }
 0x22a   :  { %v377_v4 = vmul.f32 %v330_v45, %v4009_v3 }
 0x22b   :  { %v3112_v46 = vpop.f32.mrf.mxu1 }
 0x22c   :  { %v380_v60 = vmul.f32 %v3112_v46, %v3985_v59 }
 0x22d   :  { %v340_v47 = vpop.f32.mrf.mxu1 }
 0x22e   :  { %v379_v62 = vmul.f32 %v340_v47, %v3993_v61 }
 0x22f   :  { %v3115_v48 = vpop.f32.mrf.mxu1 }
 0x230   :  { %v382_v56 = vmul.f32 %v3115_v48, %v3969_v55 }
 0x231   :  { %v350_v49 = vpop.f32.mrf.mxu1 }
 0x232   :  { %v381_v58 = vmul.f32 %v350_v49, %v3977_v57 }
 0x233   :  { %v3118_v50 = vpop.f32.mrf.mxu1 }
 0x234   :  { %v384_v51 = vmul.f32 %v3118_v50, %v85_v35  ;;  %v371_v35 = vmul.f32 %v3943_v29, %v4058_v33  ;;  %v4076_v29 = vld [vmem:[%s5036_s8] sm:$0xff] }
 0x235   :  { %v360_v53 = vpop.f32.mrf.mxu1  ;;  %v369_v37 = vmul.f32 %v3935_v25, %v4076_v29 }
 0x236   :  { %v383_v54 = vmul.f32 %v360_v53, %v3960_v52  ;;  %3159 = vmatprep.subr.msk.mxu1 %vm86_vm0, %v384_v51  ;;  %v530_v53 = vpop.f32.mrf.mxu0 }
 0x237   :  { %3160 = vmatpush3.xpose.msk.msra.mxu1 %vm86_vm0, %v384_v51 }
 0x238   :  { %3161 = vmatprep.subr.msk.mxu1 %vm86_vm0, %v383_v54 }
 0x23b   :  { %3162 = vmatpush3.xpose.msk.msra.mxu1 %vm86_vm0, %v383_v54 }
 0x23c   :  { %3163 = vmatprep.subr.msk.mxu1 %vm86_vm0, %v382_v56 }
 0x23f   :  { %3164 = vmatpush3.xpose.msk.msra.mxu1 %vm86_vm0, %v382_v56 }
 0x240   :  { %3165 = vmatprep.subr.msk.mxu1 %vm86_vm0, %v381_v58 }
 0x243   :  { %3166 = vmatpush3.xpose.msk.msra.mxu1 %vm86_vm0, %v381_v58  ;;  %v553_v58 = vmul.f32 %v530_v53, %v3960_v52  ;;  %v549_v52 = vmul.f32 %v3945_v30, %v3993_v61  ;;  %v545_v30 = vmul.f32 %v3929_v22, %v4025_v7  ;;  %v541_v22 = vmul.f32 %v3921_v18, %v4058_v33  ;;  %v2585_v18 = vld [vmem:[%s5029_s1 + $0xf0] sm:$0xff]  ;;  %v991_v53 = vld [vmem:[%s5030_s2 + $0x48] sm:$0xff] }
 0x244   :  { %3167 = vmatprep.subr.msk.mxu1 %vm86_vm0, %v380_v60 }
 0x247   :  { %3168 = vmatpush3.xpose.msk.msra.mxu1 %vm86_vm0, %v380_v60  ;;  %v552_v60 = vmul.f32 %v3947_v32, %v3969_v55  ;;  %v548_v32 = vmul.f32 %v3933_v24, %v4001_v63  ;;  %v544_v24 = vmul.f32 %v3923_v19, %v4033_v9  ;;  %v540_v19 = vmul.f32 %v3914_v14, %v4067_v27  ;;  %v2584_v14 = vld [vmem:[%s5029_s1 + $0xe8] sm:$0xff]  ;;  %v2581_v55 = vld [vmem:[%s5029_s1 + $0xd0] sm:$0xff] }
 0x248   :  { %3169 = vmatprep.subr.msk.mxu1 %vm86_vm0, %v379_v62  ;;  %v859_v9 = vsub.s32 4, %v3793_v39 }
 0x24b   :  { %3170 = vmatpush3.xpose.msk.msra.mxu1 %vm86_vm0, %v379_v62  ;;  %v551_v62 = vmul.f32 %v3949_v34, %v3977_v57  ;;  %v547_v34 = vmul.f32 %v3937_v26, %v4009_v3  ;;  %v543_v26 = vmul.f32 %v3925_v20, %v4041_v11  ;;  %v539_v20 = vmul.f32 %v3916_v16, %v4076_v29  ;;  %v2583_v16 = vld [vmem:[%s5029_s1 + $0xe0] sm:$0xff] }
 0x24c   :  { %3171 = vmatprep.subr.msk.mxu1 %vm86_vm0, %v378_v2 }
 0x24f   :  { %3172 = vmatpush3.xpose.msk.msra.mxu1 %vm86_vm0, %v378_v2  ;;  %v550_v2 = vmul.f32 %v3941_v28, %v3985_v59  ;;  %v546_v28 = vmul.f32 %v3927_v21, %v4017_v5  ;;  %v542_v21 = vmul.f32 %v3919_v17, %v4049_v15  ;;  %v2586_v17 = vld [vmem:[%s5029_s1 + $0xf8] sm:$0xff]  ;;  %v2580_v5 = vld [vmem:[%s5029_s1 + $0xc8] sm:$0xff] }
 0x250   :  { %3173 = vmatprep.subr.msk.mxu1 %vm86_vm0, %v377_v4 }
 0x253   :  { %3174 = vmatpush3.xpose.msk.msra.mxu1 %vm86_vm0, %v377_v4 }
 0x254   :  { %3175 = vmatprep.subr.msk.mxu1 %vm86_vm0, %v376_v6 }
 0x257   :  { %3176 = vmatpush3.xpose.msk.msra.mxu1 %vm86_vm0, %v376_v6  ;;  %v2579_v6 = vld [vmem:[%s5029_s1 + $0xc0] sm:$0xff] }
 0x258   :  { %3177 = vmatprep.subr.msk.mxu1 %vm86_vm0, %v375_v8 }
 0x25b   :  { %3178 = vmatpush3.xpose.msk.msra.mxu1 %vm86_vm0, %v375_v8 }
 0x25c   :  { %3179 = vmatprep.subr.msk.mxu1 %vm86_vm0, %v374_v10 }
 0x25f   :  { %3180 = vmatpush3.xpose.msk.msra.mxu1 %vm86_vm0, %v374_v10  ;;  %v860_v10 = vrot.slane %v3801_v41, %v859_v9 }
 0x260   :  { %3181 = vmatprep.subr.msk.mxu1 %vm86_vm0, %v373_v12 }
 0x263   :  { %3182 = vmatpush3.xpose.msk.msra.mxu1 %vm86_vm0, %v373_v12 }
 0x264   :  { %3183 = vmatprep.subr.msk.mxu1 %vm86_vm0, %v372_v31 }
 0x267   :  { %3184 = vmatpush3.xpose.msk.msra.mxu1 %vm86_vm0, %v372_v31 }
 0x268   :  { %3185 = vmatprep.subr.msk.mxu1 %vm86_vm0, %v371_v35 }
 0x26b   :  { %3186 = vmatpush3.xpose.msk.msra.mxu1 %vm86_vm0, %v371_v35 }
 0x26c   :  { %3187 = vmatprep.subr.msk.mxu1 %vm86_vm0, %v370_v36 }
 0x26f   :  { %3188 = vmatpush3.xpose.msk.msra.mxu1 %vm86_vm0, %v370_v36 }
 0x270   :  { %3189 = vmatprep.subr.msk.mxu1 %vm86_vm0, %v369_v37 }
 0x273   :  { %3190 = vmatpush3.xpose.msk.msra.mxu1 %vm86_vm0, %v369_v37 }
 0x274   :  { %3264 = vmatprep.subr.mxu1 %v2586_v17 }
 0x276   :  { %3192 = vmatmul.mubr.msk.f32.vlgmr.msra.gmra.mxu1 %vm86_vm0, %v3912_v13 }
 0x277   :  { %3265 = vmatpush3.msra.mxu1 %v2586_v17  ;;  %v1116_v17 = vld [vmem:[%s5031_s3 + $0x60] sm:$0xff] }
 0x278   :  { %3266 = vmatprep.subr.mxu1 %v2585_v18 }
 0x279   :  { %3267 = vmatpush3.msra.mxu1 %v2585_v18  ;;  %v1131_v18 = vld [vmem:[%s5031_s3 + $0xd8] sm:$0xff] }
 0x27a   :  { %3268 = vmatprep.subr.mxu1 %v2584_v14 }
 0x27b   :  { %3269 = vmatpush3.msra.mxu1 %v2584_v14  ;;  %v1115_v14 = vld [vmem:[%s5031_s3 + $0x58] sm:$0xff] }
 0x27c   :  { %3270 = vmatprep.subr.mxu1 %v2583_v16 }
 0x27d   :  { %3271 = vmatpush3.msra.mxu1 %v2583_v16  ;;  %v1130_v16 = vld [vmem:[%s5031_s3 + $0xd0] sm:$0xff] }
 0x336   :  { %v3193_v43 = vpop.f32.mrf.mxu1 }
 0x337   :  { %v681_v45 = vadd.f32 %v3193_v43, %v53_v23 }
 0x338   :  { %v675_v25 = vpop.f32.mrf.mxu1 }
 0x339   :  { %v676_v46 = vadd.f32 %v675_v25, %v52_v44  ;;  %686 = vmax.xlane.f32.xlu1 %v681_v45 }
 0x33b   :  { %684 = vmax.xlane.f32.xlu0 %v676_v46 }
 0x3c2   :  { %v687_v47 = vpop.xlane.xlu1 %686 }
 0x3c3   :  { %v689_v48 = vsub.f32 %v681_v45, %v687_v47  ;;  %v997_v47 = vld [vmem:[%s5030_s2 + $0x78] sm:$0xff] }
 0x3c4   :  { %v685_v49 = vpop.xlane.xlu0 %684 }
 0x3c5   :  { %v688_v50 = vsub.f32 %v676_v46, %v685_v49  ;;  %v692_v51 = vmul.f32 1.442695, %v689_v48  ;;  %v996_v48 = vld [vmem:[%s5030_s2 + $0x70] sm:$0xff]  ;;  %v995_v49 = vld [vmem:[%s5030_s2 + $0x68] sm:$0xff] }
 0x3c7   :  { %v690_v13 = vmul.f32 1.442695, %v688_v50  ;;  %v994_v50 = vld [vmem:[%s5030_s2 + $0x60] sm:$0xff] }
 0x3c9   :  { %3534 = vpow2.f32 %v690_v13  ;;  %v992_v13 = vld [vmem:[%s5030_s2 + $0x50] sm:$0xff] }
 0x3ca   :  { %3536 = vpow2.f32 %v692_v51  ;;  %v993_v51 = vld [vmem:[%s5030_s2 + $0x58] sm:$0xff] }
 0x3d6   :  { %v4091_v54 = vpop.eup %3534 }
 0x3d7   :  { %v4093_v56 = vpop.eup %3536  ;;  %3226 = vmatprep.mubr.f32.mxu0 %v4091_v54 }
 0x3d8   :  { %3227 = vmatmul.mubr.f32.vlgmr.msra.gmra.mxu0 %v4093_v56 }
 0x3d9   :  { %3230 = vmatpush3.msra.mxu0 %v3954_v38  ;;  %v2582_v38 = vld [vmem:[%s5029_s1 + $0xd8] sm:$0xff] }
 0x3da   :  { %3231 = vmatprep.subr.mxu0 %v553_v58  ;;  %3272 = vmatprep.subr.mxu1 %v2582_v38 }
 0x3db   :  { %3232 = vmatpush3.msra.mxu0 %v553_v58  ;;  %3273 = vmatpush3.msra.mxu1 %v2582_v38  ;;  %v988_v58 = vld [vmem:[%s5030_s2 + $0x30] sm:$0xff] }
 0x3dc   :  { %3233 = vmatprep.subr.mxu0 %v552_v60  ;;  %3274 = vmatprep.subr.mxu1 %v2581_v55  ;;  %v1114_v38 = vld [vmem:[%s5031_s3 + $0x50] sm:$0xff] }
 0x3dd   :  { %3234 = vmatpush3.msra.mxu0 %v552_v60  ;;  %3275 = vmatpush3.msra.mxu1 %v2581_v55  ;;  %v987_v60 = vld [vmem:[%s5030_s2 + $0x28] sm:$0xff] }
 0x3de   :  { %3235 = vmatprep.subr.mxu0 %v551_v62  ;;  %3276 = vmatprep.subr.mxu1 %v2580_v5  ;;  %v1129_v55 = vld [vmem:[%s5031_s3 + $0xc8] sm:$0xff] }
 0x3df   :  { %3236 = vmatpush3.msra.mxu0 %v551_v62  ;;  %3277 = vmatpush3.msra.mxu1 %v2580_v5  ;;  %v986_v62 = vld [vmem:[%s5030_s2 + $0x20] sm:$0xff]  ;;  %v1110_v5 = vld [vmem:[%s5031_s3 + $0x30] sm:$0xff] }
 0x3e0   :  { %3237 = vmatprep.subr.mxu0 %v550_v2  ;;  %3278 = vmatprep.subr.mxu1 %v2579_v6 }
 0x3e1   :  { %3238 = vmatpush3.msra.mxu0 %v550_v2  ;;  %3279 = vmatpush3.msra.mxu1 %v2579_v6  ;;  %v985_v2 = vld [vmem:[%s5030_s2 + $0x18] sm:$0xff]  ;;  %v1125_v6 = vld [vmem:[%s5031_s3 + $0xa8] sm:$0xff] }
 0x3e2   :  { %3239 = vmatprep.subr.mxu0 %v549_v52 }
 0x3e3   :  { %3240 = vmatpush3.msra.mxu0 %v549_v52  ;;  %v984_v52 = vld [vmem:[%s5030_s2 + $0x10] sm:$0xff] }
 0x3e4   :  { %3241 = vmatprep.subr.mxu0 %v548_v32 }
 0x3e5   :  { %3242 = vmatpush3.msra.mxu0 %v548_v32  ;;  %v3655_v32 = vmov 0.0  }
 0x3e6   :  { %3243 = vmatprep.subr.mxu0 %v547_v34 }
 0x3e7   :  { %3244 = vmatpush3.msra.mxu0 %v547_v34  ;;  %v983_v34 = vld [vmem:[%s5030_s2 + $0x8] sm:$0xff] }
 0x3e8   :  { %3245 = vmatprep.subr.mxu0 %v546_v28 }
 0x3e9   :  { %3246 = vmatpush3.msra.mxu0 %v546_v28  ;;  %v982_v28 = vld [vmem:[%s5030_s2] sm:$0xff] }
 0x3ea   :  { %3247 = vmatprep.subr.mxu0 %v545_v30 }
 0x3eb   :  { %3248 = vmatpush3.msra.mxu0 %v545_v30  ;;  %v1135_v30 = vld [vmem:[%s5031_s3 + $0xf8] sm:$0xff] }
 0x3ec   :  { %3249 = vmatprep.subr.mxu0 %v544_v24  ;;  %2852 = vmatprep.subr.mxu1 %v1135_v30 }
 0x3ed   :  { %3250 = vmatpush3.msra.mxu0 %v544_v24  ;;  %v1119_v24 = vld [vmem:[%s5031_s3 + $0x78] sm:$0xff] }
 0x3ee   :  { %3251 = vmatprep.subr.mxu0 %v543_v26 }
 0x3ef   :  { %3252 = vmatpush3.msra.mxu0 %v543_v26  ;;  %v1134_v26 = vld [vmem:[%s5031_s3 + $0xf0] sm:$0xff] }
 0x3f0   :  { %3253 = vmatprep.subr.mxu0 %v542_v21 }
 0x3f1   :  { %3254 = vmatpush3.msra.mxu0 %v542_v21  ;;  %v1118_v21 = vld [vmem:[%s5031_s3 + $0x70] sm:$0xff] }
 0x3f2   :  { %3255 = vmatprep.subr.mxu0 %v541_v22 }
 0x3f3   :  { %3256 = vmatpush3.msra.mxu0 %v541_v22  ;;  %v1133_v22 = vld [vmem:[%s5031_s3 + $0xe8] sm:$0xff] }
 0x3f4   :  { %3257 = vmatprep.subr.mxu0 %v540_v19 }
 0x3f5   :  { %3258 = vmatpush3.msra.mxu0 %v540_v19  ;;  %v1117_v19 = vld [vmem:[%s5031_s3 + $0x68] sm:$0xff] }
 0x3f6   :  { %3259 = vmatprep.subr.mxu0 %v539_v20 }
 0x3f7   :  { %3260 = vmatpush3.msra.mxu0 %v539_v20  ;;  %v1132_v20 = vld [vmem:[%s5031_s3 + $0xe0] sm:$0xff] }
 0x3f8   :  { %1039 = vmatprep.subr.mxu0 %v997_v47 }
 0x498   :  { %v3228_v57 = vpop.f32.mrf.mxu0 }
 0x499   :  { %3538 = vrcp.f32 %v3228_v57  ;;  %v1113_v57 = vld [vmem:[%s5031_s3 + $0x48] sm:$0xff] }
 0x49a   :  { %v760_v59 = vpop.f32.mrf.mxu0 }
 0x49b   :  { %3540 = vrcp.f32 %v760_v59  ;;  %v1128_v59 = vld [vmem:[%s5031_s3 + $0xc0] sm:$0xff] }
 0x4a6   :  { %v3539_v61 = vpop.eup %3538 }
 0x4a7   :  { %v772_v4 = vmul.f32 %v3539_v61, %v4093_v56  ;;  %v989_v56 = vld [vmem:[%s5030_s2 + $0x38] sm:$0xff]  ;;  %v1112_v61 = vld [vmem:[%s5031_s3 + $0x40] sm:$0xff] }
 0x4a8   :  { %v3541_v63 = vpop.eup %3540 }
 0x4a9   :  { %v770_v3 = vmul.f32 %v3541_v63, %v4091_v54  ;;  %v990_v54 = vld [vmem:[%s5030_s2 + $0x40] sm:$0xff]  ;;  %v1127_v63 = vld [vmem:[%s5031_s3 + $0xb8] sm:$0xff] }
 0x4ab   :  { %3261 = vmatprep.mubr.f32.mxu0 %v770_v3  ;;  %v1111_v3 = vld [vmem:[%s5031_s3 + $0x38] sm:$0xff] }
 0x4ac   :  { %3262 = vmatmul.mubr.f32.vlgmr.msra.gmra.mxu0 %v772_v4  ;;  %v1126_v4 = vld [vmem:[%s5031_s3 + $0xb0] sm:$0xff] }
 0x4ad   :  { %1040 = vmatpush1.msra.mxu0 %v996_v48  ;;  %1087 = vmatprep.mubr.f32.mxu0 %v3655_v32 }
 0x4ae   :  { %1041 = vmatprep.subr.mxu0 %v995_v49 }
 0x4af   :  { %1042 = vmatpush1.msra.mxu0 %v994_v50 }
 0x4b0   :  { %1043 = vmatprep.subr.mxu0 %v993_v51  ;;  %v1122_v51 = vld [vmem:[%s5031_s3 + $0x90] sm:$0xff] }
 0x4b1   :  { %1044 = vmatpush1.msra.mxu0 %v992_v13  ;;  %v1106_v13 = vld [vmem:[%s5031_s3 + $0x10] sm:$0xff] }
 0x4b2   :  { %1045 = vmatprep.subr.mxu0 %v991_v53  ;;  %v1121_v53 = vld [vmem:[%s5031_s3 + $0x88] sm:$0xff] }
 0x4b3   :  { %1046 = vmatpush1.msra.mxu0 %v990_v54  ;;  %v1105_v54 = vld [vmem:[%s5031_s3 + $0x8] sm:$0xff] }
 0x4b4   :  { %1047 = vmatprep.subr.mxu0 %v989_v56  ;;  %v1120_v56 = vld [vmem:[%s5031_s3 + $0x80] sm:$0xff] }
 0x4b5   :  { %1048 = vmatpush1.msra.mxu0 %v988_v58  ;;  %v1104_v58 = vld [vmem:[%s5031_s3] sm:$0xff] }
 0x4b6   :  { %1049 = vmatprep.subr.mxu0 %v987_v60  ;;  %v51_v60 = vld [vmem:[%s5033_s5] sm:$0xf] }
 0x4b7   :  { %1050 = vmatpush1.msra.mxu0 %v986_v62  ;;  %v1002_v62 = vrot.slane %v51_v60, %v3796_v40 }
 0x4b8   :  { %1051 = vmatprep.subr.mxu0 %v985_v2 }
 0x4b9   :  { %1052 = vmatpush1.msra.mxu0 %v984_v52  ;;  %v1012_v52 = vrot.slane %v1002_v62, %v3796_v40  ;;  %v3572_v62 = vld [vmem:[%s5035_s7 + $0x88] sm:$0xff] }
 0x4ba   :  { %1053 = vmatprep.subr.mxu0 %v983_v34 }
 0x4bb   :  { %1054 = vmatpush1.msra.mxu0 %v982_v28 }
 0x56c   :  { %v3263_v7 = vpop.f32.mrf.mxu0 }
 0x56e   :  { %v839_v8 = vpop.f32.mrf.mxu0 }
 0x56f   :  { %3280 = vmatprep.mubr.msk.f32.mxu1 %vm86_vm0, %v839_v8  ;;  %v1124_v8 = vld [vmem:[%s5031_s3 + $0xa0] sm:$0xff] }
 0x570   :  { %3281 = vmatmul.mubr.msk.f32.vlgmr.msra.gmra.mxu1 %vm86_vm0, %v3263_v7  ;;  %v1109_v7 = vld [vmem:[%s5031_s3 + $0x28] sm:$0xff] }
 0x571   :  { %2853 = vmatpush3.msra.mxu1 %v1119_v24 }
 0x572   :  { %2854 = vmatprep.subr.mxu1 %v1134_v26 }
 0x573   :  { %2855 = vmatpush3.msra.mxu1 %v1118_v21 }
 0x574   :  { %2856 = vmatprep.subr.mxu1 %v1133_v22 }
 0x575   :  { %2857 = vmatpush3.msra.mxu1 %v1117_v19 }
 0x576   :  { %2858 = vmatprep.subr.mxu1 %v1132_v20 }
 0x577   :  { %2859 = vmatpush3.msra.mxu1 %v1116_v17 }
 0x578   :  { %2860 = vmatprep.subr.mxu1 %v1131_v18 }
 0x579   :  { %2861 = vmatpush3.msra.mxu1 %v1115_v14 }
 0x57a   :  { %2862 = vmatprep.subr.mxu1 %v1130_v16 }
 0x57b   :  { %2863 = vmatpush3.msra.mxu1 %v1114_v38  ;;  %v1138_v38 = vsub.s32 5, %v3793_v39 }
 0x57c   :  { %2864 = vmatprep.subr.mxu1 %v1129_v55 }
 0x57d   :  { %2865 = vmatpush3.msra.mxu1 %v1113_v57  ;;  %v1139_v57 = vrot.slane %v3801_v41, %v1138_v38 }
 0x57e   :  { %2866 = vmatprep.subr.mxu1 %v1128_v59 }
 0x57f   :  { %2867 = vmatpush3.msra.mxu1 %v1112_v61 }
 0x580   :  { %2868 = vmatprep.subr.mxu1 %v1127_v63 }
 0x581   :  { %2869 = vmatpush3.msra.mxu1 %v1111_v3 }
 0x582   :  { %2870 = vmatprep.subr.mxu1 %v1126_v4 }
 0x583   :  { %2871 = vmatpush3.msra.mxu1 %v1110_v5 }
 0x584   :  { %2872 = vmatprep.subr.mxu1 %v1125_v6 }
 0x585   :  { %2873 = vmatpush3.msra.mxu1 %v1109_v7 }
 0x586   :  { %2874 = vmatprep.subr.mxu1 %v1124_v8 }
 0x630   :  { %v3282_v11 = vpop.f32.mrf.mxu1 }
 0x631   :  { %v939_v12 = vadd.f32 %v3282_v11, %v860_v10 }
 0x632   :  { %v933_v15 = vpop.f32.mrf.mxu1 }
 0x633   :  { %v4160_v31 = vadd.f32 %v939_v12, %v3721_v1  ;;  %v934_v33 = vadd.f32 %v933_v15, %v860_v10  ;;  %v1108_v10 = vld [vmem:[%s5031_s3 + $0x20] sm:$0xff] }
 0x634   :  { %2875 = vmatpush3.msra.mxu1 %v1108_v10 }
 0x635   :  { %v4163_v35 = vadd.f32 %v934_v33, %v3716_v0  ;;  %v947_v27 = vsel %vm86_vm0, %v4160_v31, 0.0 }
 0x636   :  { %948 = vadd.xlane.f32.xlu1 %v947_v27 }
 0x637   :  { %v944_v36 = vsel %vm86_vm0, %v4163_v35, 0.0 }
 0x638   :  { %945 = vadd.xlane.f32.xlu0 %v944_v36 }
 0x6bf   :  { %v949_v29 = vpop.xlane.xlu1 %948 }
 0x6c0   :  { %v951_v37 = vmul.f32 0.015625, %v949_v29  ;;  %v4303_v29 = vsub.s32 2, %v3793_v39 }
 0x6c1   :  { %v946_v23 = vpop.xlane.xlu0 %945 }
 0x6c2   :  { %v4170_v43 = vsub.f32 %v4160_v31, %v951_v37  ;;  %v950_v1 = vmul.f32 0.015625, %v946_v23  ;;  %v4306_v23 = vsub.s32 3, %v3793_v39  ;;  %v1006_v2 = vrot.slane %v51_v60, %v4303_v29  ;;  %v2608_v60 = vld [vmem:[%s5029_s1 + $0x178] sm:$0xff] }
 0x6c4   :  { %v4173_v44 = vsub.f32 %v4163_v35, %v950_v1  ;;  %v955_v0 = vmul.f32 %v4170_v43, %v4170_v43  ;;  %v979_v47 = vrot.slane %v3801_v41, %v4306_v23  ;;  %v1016_v34 = vrot.slane %v1006_v2, %v3796_v40 }
 0x6c6   :  { %v959_v45 = vsel %vm86_vm0, %v955_v0, 0.0  ;;  %v954_v25 = vmul.f32 %v4173_v44, %v4173_v44 }
 0x6c7   :  { %960 = vadd.xlane.f32.xlu1 %v959_v45  ;;  %v973_v45 = vrot.slane %v3801_v41, %v4303_v29 }
 0x6c8   :  { %v956_v46 = vsel %vm86_vm0, %v954_v25, 0.0 }
 0x6c9   :  { %957 = vadd.xlane.f32.xlu0 %v956_v46 }
 0x750   :  { %v961_v11 = vpop.xlane.xlu1 %960 }
 0x751   :  { %v963_v12 = vmul.f32 0.015625, %v961_v11 }
 0x752   :  { %v958_v15 = vpop.xlane.xlu0 %957 }
 0x753   :  { %v965_v33 = vadd.f32 1e-05, %v963_v12  ;;  %v962_v27 = vmul.f32 0.015625, %v958_v15 }
 0x755   :  { %3542 = vrsqrt.f32 %v965_v33  ;;  %v964_v36 = vadd.f32 1e-05, %v962_v27 }
 0x757   :  { %3544 = vrsqrt.f32 %v964_v36 }
 0x762   :  { %v3543_v37 = vpop.eup %3542 }
 0x763   :  { %v969_v25 = vmul.f32 %v3543_v37, %v4170_v43  ;;  %v1107_v43 = vld [vmem:[%s5031_s3 + $0x18] sm:$0xff] }
 0x764   :  { %v3545_v1 = vpop.eup %3544 }
 0x765   :  { %v968_v0 = vmul.f32 %v3545_v1, %v4173_v44  ;;  %v975_v49 = vmul.f32 %v973_v45, %v969_v25  ;;  %v1123_v44 = vld [vmem:[%s5031_s3 + $0x98] sm:$0xff]  ;;  %v2597_v25 = vld [vmem:[%s5029_s1 + $0x130] sm:$0xff] }
 0x766   :  { %2876 = vmatprep.subr.mxu1 %v1123_v44  ;;  %v2594_v44 = vld [vmem:[%s5029_s1 + $0x118] sm:$0xff] }
 0x767   :  { %v974_v46 = vmul.f32 %v973_v45, %v968_v0  ;;  %v981_v50 = vadd.f32 %v979_v47, %v975_v49  ;;  %2877 = vmatpush3.msra.mxu1 %v1107_v43  ;;  %v2598_v0 = vld [vmem:[%s5029_s1 + $0x138] sm:$0xff]  ;;  %v2595_v49 = vld [vmem:[%s5029_s1 + $0x120] sm:$0xff] }
 0x768   :  { %2878 = vmatprep.subr.mxu1 %v1122_v51  ;;  %3283 = vmatprep.subr.mxu0 %v2598_v0  ;;  %v2632_v45 = vld [vmem:[%s5029_s1 + $0x1b8] sm:$0xff]  ;;  %v2593_v51 = vld [vmem:[%s5029_s1 + $0x110] sm:$0xff] }
 0x769   :  { %v980_v48 = vadd.f32 %v979_v47, %v974_v46  ;;  %2879 = vmatpush3.msra.mxu1 %v1106_v13  ;;  %v2631_v46 = vld [vmem:[%s5029_s1 + $0x1b0] sm:$0xff]  ;;  %v2596_v47 = vld [vmem:[%s5029_s1 + $0x128] sm:$0xff]  ;;  %v2628_v43 = vld [vmem:[%s5029_s1 + $0x198] sm:$0xff] }
 0x76a   :  { %2880 = vmatprep.subr.mxu1 %v1121_v53  ;;  %v2627_v13 = vld [vmem:[%s5029_s1 + $0x190] sm:$0xff]  ;;  %v2592_v53 = vld [vmem:[%s5029_s1 + $0x108] sm:$0xff] }
 0x76b   :  { %2589 = vmatmul.mubr.msk.f32.vlgmr.msra.gmra.mxu0 %vm86_vm0, %v980_v48  ;;  %2881 = vmatpush3.msra.mxu1 %v1105_v54  ;;  %v2630_v48 = vld [vmem:[%s5029_s1 + $0x1a8] sm:$0xff] }
 0x76c   :  { %1093 = vmatprep.mubr.f32.mxu0 %v3655_v32  ;;  %2882 = vmatprep.subr.mxu1 %v1120_v56  ;;  %v2626_v54 = vld [vmem:[%s5029_s1 + $0x188] sm:$0xff]  ;;  %v2591_v56 = vld [vmem:[%s5029_s1 + $0x100] sm:$0xff] }
 0x76d   :  { %2883 = vmatpush3.msra.mxu1 %v1104_v58  ;;  %3284 = vmatpush3.msra.mxu0 %v2598_v0  ;;  %v2625_v58 = vld [vmem:[%s5029_s1 + $0x180] sm:$0xff]  ;;  %v3584_v0 = vld [vmem:[%s5035_s7 + $0x30] sm:$0xff] }
 0x76e   :  { %3342 = vmatprep.subr.mxu1 %v2632_v45  ;;  %3285 = vmatprep.subr.mxu0 %v2597_v25 }
 0x76f   :  { %2590 = vmatmul.mubr.msk.f32.gmra.mxu0 %vm86_vm0, %v981_v50  ;;  %v2629_v50 = vld [vmem:[%s5029_s1 + $0x1a0] sm:$0xff] }
 0x770   :  { %3286 = vmatpush3.msra.mxu0 %v2597_v25  ;;  %v3586_v25 = vld [vmem:[%s5035_s7 + $0x20] sm:$0xff] }
 0x771   :  { %3287 = vmatprep.subr.mxu0 %v2596_v47 }
 0x772   :  { %3288 = vmatpush3.msra.mxu0 %v2596_v47  ;;  %v3588_v47 = vld [vmem:[%s5035_s7 + $0x10] sm:$0xff] }
 0x773   :  { %3289 = vmatprep.subr.mxu0 %v2595_v49 }
 0x774   :  { %3290 = vmatpush3.msra.mxu0 %v2595_v49 }
 0x775   :  { %3291 = vmatprep.subr.mxu0 %v2594_v44 }
 0x776   :  { %3292 = vmatpush3.msra.mxu0 %v2594_v44 }
 0x777   :  { %3293 = vmatprep.subr.mxu0 %v2593_v51 }
 0x778   :  { %3294 = vmatpush3.msra.mxu0 %v2593_v51 }
 0x779   :  { %3295 = vmatprep.subr.mxu0 %v2592_v53 }
 0x77a   :  { %3296 = vmatpush3.msra.mxu0 %v2592_v53 }
 0x77b   :  { %3297 = vmatprep.subr.mxu0 %v2591_v56 }
 0x77c   :  { %3298 = vmatpush3.msra.mxu0 %v2591_v56 }
 0x77d   :  { %3302 = vmatprep.subr.mxu0 %v2608_v60 }
 0x82b   :  { %v1089_v28 = vpop.f32.mrf.mxu0 }
 0x82c   :  { %v1090_v30 = vadd.f32 %v1089_v28, %v1012_v52 }
 0x82d   :  { %v1091_v24 = vpop.f32.mrf.mxu0 }
 0x82e   :  { %v1092_v26 = vadd.f32 %v1091_v24, %v1016_v34  ;;  %v1100_v19 = vmax.f32 %v1090_v30, 0.0 }
 0x82f   :  { %v1095_v21 = vpop.f32.mrf.mxu0 }
 0x830   :  { %v1101_v22 = vmax.f32 %v1092_v26, 0.0  ;;  %v1096_v20 = vadd.f32 %v1095_v21, %v1012_v52  ;;  %v1245_v26 = vsub.s32 6, %v3793_v39  ;;  %v1251_v21 = vsub.s32 7, %v3793_v39 }
 0x831   :  { %v1097_v17 = vpop.f32.mrf.mxu0 }
 0x832   :  { %v1098_v18 = vadd.f32 %v1097_v17, %v1016_v34  ;;  %1204 = vmatprep.mubr.f32.mxu1 %v1101_v22  ;;  %v1102_v16 = vmax.f32 %v1096_v20, 0.0  ;;  %v3573_v22 = vld [vmem:[%s5032_s4] sm:$0xff] }
 0x833   :  { %1205 = vmatmul.mubr.f32.vlgmr.msra.gmra.mxu1 %v1100_v19  ;;  %v1246_v19 = vrot.slane %v3573_v22, %v1245_v26  ;;  %v1252_v17 = vrot.slane %v3573_v22, %v1251_v21 }
 0x834   :  { %v1103_v14 = vmax.f32 %v1098_v18, 0.0  ;;  %3343 = vmatpush3.msra.mxu1 %v2632_v45  ;;  %v3585_v45 = vld [vmem:[%s5035_s7 + $0x28] sm:$0xff] }
 0x835   :  { %3344 = vmatprep.subr.mxu1 %v2631_v46 }
 0x836   :  { %1209 = vmatprep.mubr.f32.mxu1 %v1103_v14  ;;  %3345 = vmatpush3.msra.mxu1 %v2631_v46  ;;  %v3587_v46 = vld [vmem:[%s5035_s7 + $0x18] sm:$0xff] }
 0x837   :  { %1210 = vmatmul.mubr.f32.gmra.mxu1 %v1102_v16  ;;  %3346 = vmatprep.subr.mxu1 %v2630_v48 }
 0x838   :  { %3347 = vmatpush3.msra.mxu1 %v2630_v48 }
 0x839   :  { %3348 = vmatprep.subr.mxu1 %v2629_v50 }
 0x83a   :  { %3349 = vmatpush3.msra.mxu1 %v2629_v50 }
 0x83b   :  { %3350 = vmatprep.subr.mxu1 %v2628_v43 }
 0x83c   :  { %3351 = vmatpush3.msra.mxu1 %v2628_v43 }
 0x83d   :  { %3352 = vmatprep.subr.mxu1 %v2627_v13 }
 0x83e   :  { %3353 = vmatpush3.msra.mxu1 %v2627_v13 }
 0x83f   :  { %3354 = vmatprep.subr.mxu1 %v2626_v54 }
 0x840   :  { %3355 = vmatpush3.msra.mxu1 %v2626_v54 }
 0x841   :  { %3356 = vmatprep.subr.mxu1 %v2625_v58 }
 0x842   :  { %3357 = vmatpush3.msra.mxu1 %v2625_v58 }
 0x843   :  { %3417 = vmatprep.subr.mxu1 %v3572_v62 }
 0x8f3   :  { %v2884_v55 = vpop.f32.mrf.mxu1 }
 0x8f5   :  { %v2885_v59 = vpop.f32.mrf.mxu1 }
 0x8f6   :  { %v2886_v61 = vadd.f32 %v2885_v59, %v2884_v55 }
 0x8f7   :  { %v2887_v63 = vpop.f32.mrf.mxu1 }
 0x8f8   :  { %v1207_v3 = vadd.f32 %v2886_v61, %v1139_v57 }
 0x8f9   :  { %v2888_v4 = vpop.f32.mrf.mxu1 }
 0x8fa   :  { %v4353_v5 = vadd.f32 %v1207_v3, %v4163_v35  ;;  %v2889_v6 = vadd.f32 %v2888_v4, %v2887_v63  ;;  %v2607_v63 = vld [vmem:[%s5029_s1 + $0x170] sm:$0xff]  ;;  %v2606_v3 = vld [vmem:[%s5029_s1 + $0x168] sm:$0xff]  ;;  %v2605_v4 = vld [vmem:[%s5029_s1 + $0x160] sm:$0xff] }
 0x8fc   :  { %v1212_v7 = vadd.f32 %v2889_v6, %v1139_v57  ;;  %v1217_v8 = vsel %vm86_vm0, %v4353_v5, 0.0  ;;  %v2604_v6 = vld [vmem:[%s5029_s1 + $0x158] sm:$0xff] }
 0x8fd   :  { %1218 = vadd.xlane.f32.xlu0 %v1217_v8  ;;  %v2603_v8 = vld [vmem:[%s5029_s1 + $0x150] sm:$0xff] }
 0x8fe   :  { %v4358_v10 = vadd.f32 %v1212_v7, %v4160_v31  ;;  %v3574_v7 = vld [vmem:[%s5035_s7 + $0x80] sm:$0xff] }
 0x900   :  { %v1220_v41 = vsel %vm86_vm0, %v4358_v10, 0.0 }
 0x901   :  { %1221 = vadd.xlane.f32.xlu1 %v1220_v41  ;;  %v2602_v41 = vld [vmem:[%s5029_s1 + $0x148] sm:$0xff] }
 0x986   :  { %v1219_v11 = vpop.xlane.xlu0 %1218 }
 0x987   :  { %v1223_v12 = vmul.f32 0.015625, %v1219_v11  ;;  %v3575_v11 = vld [vmem:[%s5035_s7 + $0x78] sm:$0xff] }
 0x989   :  { %v4363_v15 = vsub.f32 %v4353_v5, %v1223_v12  ;;  %v2601_v12 = vld [vmem:[%s5029_s1 + $0x140] sm:$0xff] }
 0x98a   :  { %v1222_v35 = vpop.xlane.xlu1 %1221 }
 0x98b   :  { %v1224_v33 = vmul.f32 0.015625, %v1222_v35  ;;  %v1227_v27 = vmul.f32 %v4363_v15, %v4363_v15  ;;  %v3577_v35 = vld [vmem:[%s5035_s7 + $0x68] sm:$0xff] }
 0x98d   :  { %v4368_v36 = vsub.f32 %v4358_v10, %v1224_v33  ;;  %v1229_v31 = vsel %vm86_vm0, %v1227_v27, 0.0  ;;  %v3578_v33 = vld [vmem:[%s5035_s7 + $0x60] sm:$0xff]  ;;  %v3579_v27 = vld [vmem:[%s5035_s7 + $0x58] sm:$0xff] }
 0x98e   :  { %1230 = vadd.xlane.f32.xlu0 %v1229_v31  ;;  %v3581_v31 = vld [vmem:[%s5035_s7 + $0x48] sm:$0xff] }
 0x98f   :  { %v1228_v37 = vmul.f32 %v4368_v36, %v4368_v36 }
 0x991   :  { %v1232_v1 = vsel %vm86_vm0, %v1228_v37, 0.0  ;;  %v3582_v37 = vld [vmem:[%s5035_s7 + $0x40] sm:$0xff] }
 0x992   :  { %1233 = vadd.xlane.f32.xlu1 %v1232_v1  ;;  %v3583_v1 = vld [vmem:[%s5035_s7 + $0x38] sm:$0xff] }
 0xa17   :  { %v1231_v2 = vpop.xlane.xlu0 %1230 }
 0xa18   :  { %v1235_v52 = vmul.f32 0.015625, %v1231_v2 }
 0xa1a   :  { %v1237_v34 = vadd.f32 1e-05, %v1235_v52 }
 0xa1b   :  { %v1234_v28 = vpop.xlane.xlu1 %1233 }
 0xa1c   :  { %3546 = vrsqrt.f32 %v1237_v34  ;;  %v1236_v30 = vmul.f32 0.015625, %v1234_v28 }
 0xa1e   :  { %v1238_v24 = vadd.f32 1e-05, %v1236_v30 }
 0xa20   :  { %3548 = vrsqrt.f32 %v1238_v24 }
 0xa29   :  { %v3547_v20 = vpop.eup %3546 }
 0xa2a   :  { %v1241_v18 = vmul.f32 %v3547_v20, %v4363_v15  ;;  %v3576_v15 = vld [vmem:[%s5035_s7 + $0x70] sm:$0xff] }
 0xa2c   :  { %v1247_v14 = vmul.f32 %v1246_v19, %v1241_v18 }
 0xa2d   :  { %v3549_v16 = vpop.eup %3548 }
 0xa2e   :  { %v4434_v55 = vadd.f32 %v1252_v17, %v1247_v14  ;;  %v1242_v57 = vmul.f32 %v3549_v16, %v4368_v36  ;;  %v3580_v36 = vld [vmem:[%s5035_s7 + $0x50] sm:$0xff] }
 0xa30   :  { %v1248_v59 = vmul.f32 %v1246_v19, %v1242_v57  ;;  %3299 = vmatprep.mubr.msk.f32.mxu0 %vm86_vm0, %v4434_v55  ;;  %3358 = vmatprep.mubr.msk.f32.mxu1 %vm86_vm0, %v4434_v55 }
 0xa32   :  { %v4441_v61 = vadd.f32 %v1252_v17, %v1248_v59  ;;  %v3589_v17 = vld [vmem:[%s5036_s8 + $0x78] sm:$0xff] }
 0xa34   :  { %3300 = vmatmul.mubr.msk.f32.vlgmr.msra.gmra.mxu0 %vm86_vm0, %v4441_v61  ;;  %3359 = vmatmul.mubr.msk.f32.vlgmr.msra.gmra.mxu1 %vm86_vm0, %v4441_v61 }
 0xa35   :  { %3303 = vmatpush3.msra.mxu0 %v2608_v60  ;;  %3318 = vmatprep.mubr.msk.f32.mxu0 %vm86_vm0, %v4434_v55 }
 0xa36   :  { %3304 = vmatprep.subr.mxu0 %v2607_v63  ;;  %3361 = vmatprep.mubr.msk.f32.mxu1 %vm86_vm0, %v4434_v55 }
 0xa37   :  { %3305 = vmatpush3.msra.mxu0 %v2607_v63  ;;  %3418 = vmatpush3.msra.mxu1 %v3572_v62 }
 0xa38   :  { %3306 = vmatprep.subr.mxu0 %v2606_v3  ;;  %3362 = vmatmul.mubr.msk.f32.gmra.mxu1 %vm86_vm0, %v4441_v61 }
 0xa39   :  { %3307 = vmatpush3.msra.mxu0 %v2606_v3  ;;  %3364 = vmatprep.mubr.msk.f32.mxu1 %vm86_vm0, %v4434_v55 }
 0xa3a   :  { %3308 = vmatprep.subr.mxu0 %v2605_v4  ;;  %3419 = vmatprep.subr.mxu1 %v3574_v7 }
 0xa3b   :  { %3309 = vmatpush3.msra.mxu0 %v2605_v4  ;;  %3420 = vmatpush3.msra.mxu1 %v3574_v7  ;;  %v4621_v7 = vld [vmem:[%s5036_s8 + $0x70] sm:$0xff] }
 0xa3c   :  { %3310 = vmatprep.subr.mxu0 %v2604_v6  ;;  %3365 = vmatmul.mubr.msk.f32.gmra.mxu1 %vm86_vm0, %v4441_v61 }
 0xa3d   :  { %3311 = vmatpush3.msra.mxu0 %v2604_v6  ;;  %3367 = vmatprep.mubr.msk.f32.mxu1 %vm86_vm0, %v4434_v55 }
 0xa3e   :  { %3312 = vmatprep.subr.mxu0 %v2603_v8  ;;  %3421 = vmatprep.subr.mxu1 %v3575_v11 }
 0xa3f   :  { %3313 = vmatpush3.msra.mxu0 %v2603_v8  ;;  %3422 = vmatpush3.msra.mxu1 %v3575_v11 }
 0xa40   :  { %3314 = vmatprep.subr.mxu0 %v2602_v41  ;;  %3368 = vmatmul.mubr.msk.f32.gmra.mxu1 %vm86_vm0, %v4441_v61 }
 0xa41   :  { %3315 = vmatpush3.msra.mxu0 %v2602_v41  ;;  %3370 = vmatprep.mubr.msk.f32.mxu1 %vm86_vm0, %v4434_v55  ;;  %v4630_v41 = vld [vmem:[%s5036_s8 + $0x68] sm:$0xff] }
 0xa42   :  { %3316 = vmatprep.subr.mxu0 %v2601_v12  ;;  %3423 = vmatprep.subr.mxu1 %v3576_v15 }
 0xa43   :  { %3317 = vmatpush3.msra.mxu0 %v2601_v12  ;;  %3424 = vmatpush3.msra.mxu1 %v3576_v15  ;;  %v4638_v12 = vld [vmem:[%s5036_s8 + $0x60] sm:$0xff] }
 0xa44   :  { %3319 = vmatmul.mubr.msk.f32.vlgmr.msra.gmra.mxu0 %vm86_vm0, %v4441_v61  ;;  %3371 = vmatmul.mubr.msk.f32.gmra.mxu1 %vm86_vm0, %v4441_v61 }
 0xa45   :  { %3321 = vmatprep.mubr.msk.f32.mxu0 %vm86_vm0, %v4434_v55  ;;  %3373 = vmatprep.mubr.msk.f32.mxu1 %vm86_vm0, %v4434_v55 }
 0xa46   :  { %3425 = vmatprep.subr.mxu1 %v3577_v35 }
 0xa47   :  { %3426 = vmatpush3.msra.mxu1 %v3577_v35  ;;  %v4646_v35 = vld [vmem:[%s5036_s8 + $0x58] sm:$0xff] }
 0xa48   :  { %3322 = vmatmul.mubr.msk.f32.gmra.mxu0 %vm86_vm0, %v4441_v61  ;;  %3374 = vmatmul.mubr.msk.f32.gmra.mxu1 %vm86_vm0, %v4441_v61 }
 0xa49   :  { %3324 = vmatprep.mubr.msk.f32.mxu0 %vm86_vm0, %v4434_v55  ;;  %3376 = vmatprep.mubr.msk.f32.mxu1 %vm86_vm0, %v4434_v55 }
 0xa4a   :  { %3427 = vmatprep.subr.mxu1 %v3578_v33 }
 0xa4b   :  { %3428 = vmatpush3.msra.mxu1 %v3578_v33 }
 0xa4c   :  { %3325 = vmatmul.mubr.msk.f32.gmra.mxu0 %vm86_vm0, %v4441_v61  ;;  %3377 = vmatmul.mubr.msk.f32.gmra.mxu1 %vm86_vm0, %v4441_v61 }
 0xa4d   :  { %3327 = vmatprep.mubr.msk.f32.mxu0 %vm86_vm0, %v4434_v55  ;;  %3379 = vmatprep.mubr.msk.f32.mxu1 %vm86_vm0, %v4434_v55 }
 0xa4e   :  { %3429 = vmatprep.subr.mxu1 %v3579_v27 }
 0xa4f   :  { %3430 = vmatpush3.msra.mxu1 %v3579_v27  ;;  %v4654_v27 = vld [vmem:[%s5036_s8 + $0x50] sm:$0xff] }
 0xa50   :  { %3328 = vmatmul.mubr.msk.f32.gmra.mxu0 %vm86_vm0, %v4441_v61  ;;  %3380 = vmatmul.mubr.msk.f32.gmra.mxu1 %vm86_vm0, %v4441_v61 }
 0xa51   :  { %3330 = vmatprep.mubr.msk.f32.mxu0 %vm86_vm0, %v4434_v55  ;;  %3431 = vmatprep.subr.mxu1 %v3580_v36 }
 0xa52   :  { %3432 = vmatpush3.msra.mxu1 %v3580_v36 }
 0xa53   :  { %3433 = vmatprep.subr.mxu1 %v3581_v31 }
 0xa54   :  { %3331 = vmatmul.mubr.msk.f32.gmra.mxu0 %vm86_vm0, %v4441_v61  ;;  %3434 = vmatpush3.msra.mxu1 %v3581_v31  ;;  %v4662_v31 = vld [vmem:[%s5036_s8 + $0x48] sm:$0xff] }
 0xa55   :  { %3333 = vmatprep.mubr.msk.f32.mxu0 %vm86_vm0, %v4434_v55  ;;  %3435 = vmatprep.subr.mxu1 %v3582_v37 }
 0xa56   :  { %3436 = vmatpush3.msra.mxu1 %v3582_v37 }
 0xa57   :  { %3437 = vmatprep.subr.mxu1 %v3583_v1 }
 0xa58   :  { %3334 = vmatmul.mubr.msk.f32.gmra.mxu0 %vm86_vm0, %v4441_v61  ;;  %3438 = vmatpush3.msra.mxu1 %v3583_v1  ;;  %v4670_v1 = vld [vmem:[%s5036_s8 + $0x40] sm:$0xff] }
 0xa59   :  { %3336 = vmatprep.mubr.msk.f32.mxu0 %vm86_vm0, %v4434_v55  ;;  %3439 = vmatprep.subr.mxu1 %v3584_v0 }
 0xa5a   :  { %3440 = vmatpush3.msra.mxu1 %v3584_v0 }
 0xa5b   :  { %3441 = vmatprep.subr.mxu1 %v3585_v45 }
 0xa5c   :  { %3337 = vmatmul.mubr.msk.f32.gmra.mxu0 %vm86_vm0, %v4441_v61  ;;  %3442 = vmatpush3.msra.mxu1 %v3585_v45  ;;  %v4678_v45 = vld [vmem:[%s5036_s8 + $0x38] sm:$0xff] }
 0xa5d   :  { %3339 = vmatprep.mubr.msk.f32.mxu0 %vm86_vm0, %v4434_v55  ;;  %3443 = vmatprep.subr.mxu1 %v3586_v25 }
 0xa5e   :  { %3444 = vmatpush3.msra.mxu1 %v3586_v25 }
 0xa5f   :  { %3445 = vmatprep.subr.mxu1 %v3587_v46 }
 0xa60   :  { %3340 = vmatmul.mubr.msk.f32.gmra.mxu0 %vm86_vm0, %v4441_v61  ;;  %3446 = vmatpush3.msra.mxu1 %v3587_v46  ;;  %v4686_v46 = vld [vmem:[%s5036_s8 + $0x30] sm:$0xff] }
 0xa61   :  { %3447 = vmatprep.subr.mxu1 %v3588_v47 }
 0xa62   :  { %3448 = vmatpush3.msra.mxu1 %v3588_v47 }
 0xaf4   :  { %v4573_v48 = vpop.f32.mrf.mxu0  ;;  %v4575_v49 = vpop.f32.mrf.mxu1 }
 0xaf6   :  { %v1336_v50 = vpop.f32.mrf.mxu0  ;;  %v4577_v44 = vpop.f32.mrf.mxu1 }
 0xaf7   :  { %3414 = vmatprep.mubr.msk.f32.mxu0 %vm86_vm0, %v1336_v50  ;;  %v4694_v50 = vld [vmem:[%s5036_s8 + $0x28] sm:$0xff] }
 0xaf8   :  { %v4580_v43 = vpop.f32.mrf.mxu1 }
 0xafa   :  { %v4582_v51 = vpop.f32.mrf.mxu1 }
 0xafc   :  { %v4584_v13 = vpop.f32.mrf.mxu1 }
 0xafe   :  { %v4586_v53 = vpop.f32.mrf.mxu1 }
 0xb00   :  { %v4588_v54 = vpop.f32.mrf.mxu1 }
 0xb02   :  { %v4590_v56 = vpop.f32.mrf.mxu1 }
 0xb04   :  { %v4592_v58 = vpop.f32.mrf.mxu0  ;;  %v4594_v60 = vpop.f32.mrf.mxu1 }
 0xb06   :  { %v4596_v62 = vpop.f32.mrf.mxu0  ;;  %v4598_v2 = vpop.f32.mrf.mxu1 }
 0xb08   :  { %v4600_v52 = vpop.f32.mrf.mxu0  ;;  %v4602_v34 = vpop.f32.mrf.mxu1 }
 0xb0a   :  { %v4604_v28 = vpop.f32.mrf.mxu0  ;;  %v4606_v30 = vpop.f32.mrf.mxu1 }
 0xb0c   :  { %v3326_v24 = vpop.f32.mrf.mxu0  ;;  %v4608_v26 = vpop.f32.mrf.mxu1 }
 0xb0e   :  { %v1440_v21 = vpop.f32.mrf.mxu0  ;;  %v4610_v22 = vpop.f32.mrf.mxu1 }
 0xb10   :  { %v3329_v19 = vpop.f32.mrf.mxu0  ;;  %v3381_v20 = vpop.f32.mrf.mxu1 }
 0xb11   :  { %v4615_v18 = vmul.f32 %v3589_v17, %v3381_v20  ;;  %v1506_v25 = vmul.f32 %v4678_v45, %v3329_v19  ;;  %v1504_v19 = vmul.f32 %v4694_v50, %v3326_v24  ;;  %v4702_v20 = vld [vmem:[%s5036_s8 + $0x20] sm:$0xff] }
 0xb12   :  { %v1450_v14 = vpop.f32.mrf.mxu0 }
 0xb13   :  { %3452 = vmatprep.subr.mxu1 %v4615_v18  ;;  %v1505_v47 = vmul.f32 %v4686_v46, %v1450_v14  ;;  %v4710_v14 = vld [vmem:[%s5036_s8 + $0x18] sm:$0xff] }
 0xb14   :  { %v3332_v16 = vpop.f32.mrf.mxu0  ;;  %v1502_v24 = vmul.f32 %v4710_v14, %v4600_v52  ;;  %v4728_v52 = vld [vmem:[%s5036_s8 + $0x8] sm:$0xff] }
 0xb15   :  { %v1508_v37 = vmul.f32 %v4662_v31, %v3332_v16 }
 0xb16   :  { %v1460_v55 = vpop.f32.mrf.mxu0 }
 0xb17   :  { %v1507_v0 = vmul.f32 %v4670_v1, %v1460_v55  ;;  %v1500_v55 = vmul.f32 %v4728_v52, %v4592_v58 }
 0xb18   :  { %v3335_v57 = vpop.f32.mrf.mxu0 }
 0xb19   :  { %v1510_v33 = vmul.f32 %v4646_v35, %v3335_v57 }
 0xb1a   :  { %v1470_v59 = vpop.f32.mrf.mxu0 }
 0xb1b   :  { %v1509_v36 = vmul.f32 %v4654_v27, %v1470_v59  ;;  %v3605_v59 = vld [vmem:[%s5035_s7 + $0x8] sm:$0xff] }
 0xb1c   :  { %v3338_v61 = vpop.f32.mrf.mxu0 }
 0xb1d   :  { %v1512_v11 = vmul.f32 %v4630_v41, %v3338_v61 }
 0xb1e   :  { %v1480_v63 = vpop.f32.mrf.mxu0 }
 0xb1f   :  { %v1511_v15 = vmul.f32 %v4638_v12, %v1480_v63 }
 0xb20   :  { %v3341_v3 = vpop.f32.mrf.mxu0 }
 0xb21   :  { %v1514_v4 = vmul.f32 %v3589_v17, %v3341_v3  ;;  %v1503_v17 = vmul.f32 %v4702_v20, %v1440_v21  ;;  %v4719_v21 = vld [vmem:[%s5036_s8 + $0x10] sm:$0xff] }
 0xb22   :  { %v1490_v6 = vpop.f32.mrf.mxu0  ;;  %v1501_v16 = vmul.f32 %v4719_v21, %v4604_v28  ;;  %v4737_v28 = vld [vmem:[%s5036_s8] sm:$0xff] }
 0xb23   :  { %v1513_v8 = vmul.f32 %v4621_v7, %v1490_v6  ;;  %3382 = vmatprep.subr.msk.mxu0 %vm86_vm0, %v1514_v4  ;;  %v1499_v57 = vmul.f32 %v4737_v28, %v4596_v62  ;;  %v3606_v62 = vld [vmem:[%s5035_s7] sm:$0xff] }
 0xb24   :  { %3383 = vmatpush3.xpose.msk.msra.mxu0 %vm86_vm0, %v1514_v4 }
 0xb25   :  { %3384 = vmatprep.subr.msk.mxu0 %vm86_vm0, %v1513_v8 }
 0xb28   :  { %3385 = vmatpush3.xpose.msk.msra.mxu0 %vm86_vm0, %v1513_v8 }
 0xb29   :  { %3386 = vmatprep.subr.msk.mxu0 %vm86_vm0, %v1512_v11 }
 0xb2c   :  { %3387 = vmatpush3.xpose.msk.msra.mxu0 %vm86_vm0, %v1512_v11 }
 0xb2d   :  { %3388 = vmatprep.subr.msk.mxu0 %vm86_vm0, %v1511_v15 }
 0xb30   :  { %3389 = vmatpush3.xpose.msk.msra.mxu0 %vm86_vm0, %v1511_v15 }
 0xb31   :  { %3390 = vmatprep.subr.msk.mxu0 %vm86_vm0, %v1510_v33 }
 0xb34   :  { %3391 = vmatpush3.xpose.msk.msra.mxu0 %vm86_vm0, %v1510_v33  ;;  %v1660_v33 = vpop.f32.mrf.mxu1 }
 0xb35   :  { %3392 = vmatprep.subr.msk.mxu0 %vm86_vm0, %v1509_v36 }
 0xb38   :  { %3393 = vmatpush3.xpose.msk.msra.mxu0 %vm86_vm0, %v1509_v36 }
 0xb39   :  { %3394 = vmatprep.subr.msk.mxu0 %vm86_vm0, %v1508_v37 }
 0xb3c   :  { %3395 = vmatpush3.xpose.msk.msra.mxu0 %vm86_vm0, %v1508_v37 }
 0xb3d   :  { %3396 = vmatprep.subr.msk.mxu0 %vm86_vm0, %v1507_v0 }
 0xb40   :  { %3397 = vmatpush3.xpose.msk.msra.mxu0 %vm86_vm0, %v1507_v0  ;;  %v1683_v0 = vmul.f32 %v4621_v7, %v1660_v33  ;;  %v1679_v7 = vmul.f32 %v4654_v27, %v4606_v30  ;;  %v1675_v30 = vmul.f32 %v4686_v46, %v4590_v56  ;;  %v1671_v56 = vmul.f32 %v4719_v21, %v4582_v51  ;;  %v2673_v51 = vld [vmem:[%s5029_s1 + $0x1f0] sm:$0xff]  ;;  %v2668_v46 = vld [vmem:[%s5029_s1 + $0x1c8] sm:$0xff]  ;;  %v2689_v33 = vld [vmem:[%s5030_s2 + $0xe0] sm:$0xff] }
 0xb41   :  { %3398 = vmatprep.subr.msk.mxu0 %vm86_vm0, %v1506_v25 }
 0xb44   :  { %3399 = vmatpush3.xpose.msk.msra.mxu0 %vm86_vm0, %v1506_v25  ;;  %v1682_v25 = vmul.f32 %v4630_v41, %v4608_v26  ;;  %v1678_v26 = vmul.f32 %v4662_v31, %v4594_v60  ;;  %v1674_v60 = vmul.f32 %v4694_v50, %v4584_v13  ;;  %v1670_v13 = vmul.f32 %v4728_v52, %v4575_v49  ;;  %v2672_v49 = vld [vmem:[%s5029_s1 + $0x1e8] sm:$0xff]  ;;  %v2669_v41 = vld [vmem:[%s5029_s1 + $0x1d0] sm:$0xff]  ;;  %v2667_v50 = vld [vmem:[%s5029_s1 + $0x1c0] sm:$0xff] }
 0xb45   :  { %3400 = vmatprep.subr.msk.mxu0 %vm86_vm0, %v1505_v47 }
 0xb48   :  { %3401 = vmatpush3.xpose.msk.msra.mxu0 %vm86_vm0, %v1505_v47  ;;  %v1681_v47 = vmul.f32 %v4638_v12, %v4610_v22  ;;  %v1677_v22 = vmul.f32 %v4670_v1, %v4598_v2  ;;  %v1673_v2 = vmul.f32 %v4702_v20, %v4586_v53  ;;  %v1669_v53 = vmul.f32 %v4737_v28, %v4577_v44  ;;  %v2671_v44 = vld [vmem:[%s5029_s1 + $0x1e0] sm:$0xff] }
 0xb49   :  { %3402 = vmatprep.subr.msk.mxu0 %vm86_vm0, %v1504_v19 }
 0xb4c   :  { %3403 = vmatpush3.xpose.msk.msra.mxu0 %vm86_vm0, %v1504_v19  ;;  %v1680_v19 = vmul.f32 %v4646_v35, %v4602_v34  ;;  %v1676_v34 = vmul.f32 %v4678_v45, %v4588_v54  ;;  %v1672_v54 = vmul.f32 %v4710_v14, %v4580_v43  ;;  %v2674_v43 = vld [vmem:[%s5029_s1 + $0x1f8] sm:$0xff]  ;;  %v4820_v14 = vld [vmem:[%s5032_s4 + $0x8] sm:$0x3f] }
 0xb4d   :  { %3404 = vmatprep.subr.msk.mxu0 %vm86_vm0, %v1503_v17 }
 0xb50   :  { %3405 = vmatpush3.xpose.msk.msra.mxu0 %vm86_vm0, %v1503_v17 }
 0xb51   :  { %3406 = vmatprep.subr.msk.mxu0 %vm86_vm0, %v1502_v24 }
 0xb54   :  { %3407 = vmatpush3.xpose.msk.msra.mxu0 %vm86_vm0, %v1502_v24  ;;  %v1990_v24 = vrot.slane %v4820_v14, %v4303_v29 }
 0xb55   :  { %3408 = vmatprep.subr.msk.mxu0 %vm86_vm0, %v1501_v16 }
 0xb58   :  { %3409 = vmatpush3.xpose.msk.msra.mxu0 %vm86_vm0, %v1501_v16 }
 0xb59   :  { %3410 = vmatprep.subr.msk.mxu0 %vm86_vm0, %v1500_v55 }
 0xb5c   :  { %3411 = vmatpush3.xpose.msk.msra.mxu0 %vm86_vm0, %v1500_v55 }
 0xb5d   :  { %3412 = vmatprep.subr.msk.mxu0 %vm86_vm0, %v1499_v57 }
 0xb60   :  { %3413 = vmatpush3.xpose.msk.msra.mxu0 %vm86_vm0, %v1499_v57 }
 0xb61   :  { %3487 = vmatprep.subr.mxu0 %v2674_v43 }
 0xb63   :  { %3415 = vmatmul.mubr.msk.f32.vlgmr.msra.gmra.mxu0 %vm86_vm0, %v4573_v48 }
 0xb64   :  { %3488 = vmatpush3.msra.mxu0 %v2674_v43  ;;  %v2708_v43 = vld [vmem:[%s5031_s3 + $0x168] sm:$0xff] }
 0xb65   :  { %3489 = vmatprep.subr.mxu0 %v2673_v51 }
 0xb66   :  { %3490 = vmatpush3.msra.mxu0 %v2673_v51  ;;  %v2723_v51 = vld [vmem:[%s5031_s3 + $0x1e0] sm:$0xff] }
 0xb67   :  { %3491 = vmatprep.subr.mxu0 %v2672_v49 }
 0xb68   :  { %3492 = vmatpush3.msra.mxu0 %v2672_v49  ;;  %v2707_v49 = vld [vmem:[%s5031_s3 + $0x160] sm:$0xff] }
 0xb69   :  { %3493 = vmatprep.subr.mxu0 %v2671_v44 }
 0xb6a   :  { %3494 = vmatpush3.msra.mxu0 %v2671_v44  ;;  %v2722_v44 = vld [vmem:[%s5031_s3 + $0x1d8] sm:$0xff] }
 0xc23   :  { %v3416_v58 = vpop.f32.mrf.mxu0 }
 0xc24   :  { %v1811_v61 = vadd.f32 %v3605_v59, %v3416_v58 }
 0xc25   :  { %v1805_v63 = vpop.f32.mrf.mxu0 }
 0xc26   :  { %v1806_v3 = vadd.f32 %v3606_v62, %v1805_v63  ;;  %1816 = vmax.xlane.f32.xlu1 %v1811_v61 }
 0xc28   :  { %1814 = vmax.xlane.f32.xlu0 %v1806_v3 }
 0xcaf   :  { %v1817_v4 = vpop.xlane.xlu1 %1816 }
 0xcb0   :  { %v1819_v6 = vsub.f32 %v1811_v61, %v1817_v4 }
 0xcb1   :  { %v1815_v8 = vpop.xlane.xlu0 %1814 }
 0xcb2   :  { %v1818_v11 = vsub.f32 %v1806_v3, %v1815_v8  ;;  %v1822_v15 = vmul.f32 1.442695, %v1819_v6 }
 0xcb4   :  { %v1820_v48 = vmul.f32 1.442695, %v1818_v11  ;;  %v2692_v11 = vld [vmem:[%s5030_s2 + $0xf8] sm:$0xff] }
 0xcb6   :  { %3550 = vpow2.f32 %v1820_v48  ;;  %v2690_v48 = vld [vmem:[%s5030_s2 + $0xe8] sm:$0xff] }
 0xcb7   :  { %3552 = vpow2.f32 %v1822_v15  ;;  %v2691_v15 = vld [vmem:[%s5030_s2 + $0xf0] sm:$0xff] }
 0xcc3   :  { %v4752_v36 = vpop.eup %3550 }
 0xcc4   :  { %v4754_v37 = vpop.eup %3552  ;;  %3449 = vmatprep.mubr.f32.mxu1 %v4752_v36 }
 0xcc5   :  { %3450 = vmatmul.mubr.f32.vlgmr.msra.gmra.mxu1 %v4754_v37 }
 0xcc6   :  { %3453 = vmatpush3.msra.mxu1 %v4615_v18  ;;  %v2670_v18 = vld [vmem:[%s5029_s1 + $0x1d8] sm:$0xff] }
 0xcc7   :  { %3454 = vmatprep.subr.mxu1 %v1683_v0  ;;  %3495 = vmatprep.subr.mxu0 %v2670_v18 }
 0xcc8   :  { %3455 = vmatpush3.msra.mxu1 %v1683_v0  ;;  %3496 = vmatpush3.msra.mxu0 %v2670_v18  ;;  %v2686_v0 = vld [vmem:[%s5030_s2 + $0xc8] sm:$0xff]  ;;  %v2706_v18 = vld [vmem:[%s5031_s3 + $0x158] sm:$0xff] }
 0xcc9   :  { %3456 = vmatprep.subr.mxu1 %v1682_v25  ;;  %3497 = vmatprep.subr.mxu0 %v2669_v41 }
 0xcca   :  { %3457 = vmatpush3.msra.mxu1 %v1682_v25  ;;  %3498 = vmatpush3.msra.mxu0 %v2669_v41  ;;  %v2685_v25 = vld [vmem:[%s5030_s2 + $0xc0] sm:$0xff]  ;;  %v2721_v41 = vld [vmem:[%s5031_s3 + $0x1d0] sm:$0xff] }
 0xccb   :  { %3458 = vmatprep.subr.mxu1 %v1681_v47  ;;  %3499 = vmatprep.subr.mxu0 %v2668_v46 }
 0xccc   :  { %3459 = vmatpush3.msra.mxu1 %v1681_v47  ;;  %3500 = vmatpush3.msra.mxu0 %v2668_v46  ;;  %v2684_v47 = vld [vmem:[%s5030_s2 + $0xb8] sm:$0xff] }
 0xccd   :  { %3460 = vmatprep.subr.mxu1 %v1680_v19  ;;  %3501 = vmatprep.subr.mxu0 %v2667_v50  ;;  %v2702_v46 = vld [vmem:[%s5031_s3 + $0x138] sm:$0xff] }
 0xcce   :  { %3461 = vmatpush3.msra.mxu1 %v1680_v19  ;;  %3502 = vmatpush3.msra.mxu0 %v2667_v50  ;;  %v2683_v19 = vld [vmem:[%s5030_s2 + $0xb0] sm:$0xff] }
 0xccf   :  { %3462 = vmatprep.subr.mxu1 %v1679_v7  ;;  %v2717_v50 = vld [vmem:[%s5031_s3 + $0x1b0] sm:$0xff] }
 0xcd0   :  { %3463 = vmatpush3.msra.mxu1 %v1679_v7  ;;  %v2682_v7 = vld [vmem:[%s5030_s2 + $0xa8] sm:$0xff] }
 0xcd1   :  { %3464 = vmatprep.subr.mxu1 %v1678_v26 }
 0xcd2   :  { %3465 = vmatpush3.msra.mxu1 %v1678_v26  ;;  %v2681_v26 = vld [vmem:[%s5030_s2 + $0xa0] sm:$0xff] }
 0xcd3   :  { %3466 = vmatprep.subr.mxu1 %v1677_v22 }
 0xcd4   :  { %3467 = vmatpush3.msra.mxu1 %v1677_v22  ;;  %v2680_v22 = vld [vmem:[%s5030_s2 + $0x98] sm:$0xff] }
 0xcd5   :  { %3468 = vmatprep.subr.mxu1 %v1676_v34 }
 0xcd6   :  { %3469 = vmatpush3.msra.mxu1 %v1676_v34  ;;  %v2679_v34 = vld [vmem:[%s5030_s2 + $0x90] sm:$0xff] }
 0xcd7   :  { %3470 = vmatprep.subr.mxu1 %v1675_v30 }
 0xcd8   :  { %3471 = vmatpush3.msra.mxu1 %v1675_v30  ;;  %v2678_v30 = vld [vmem:[%s5030_s2 + $0x88] sm:$0xff] }
 0xcd9   :  { %3472 = vmatprep.subr.mxu1 %v1674_v60 }
 0xcda   :  { %3473 = vmatpush3.msra.mxu1 %v1674_v60  ;;  %v2677_v60 = vld [vmem:[%s5030_s2 + $0x80] sm:$0xff] }
 0xcdb   :  { %3474 = vmatprep.subr.mxu1 %v1673_v2 }
 0xcdc   :  { %3475 = vmatpush3.msra.mxu1 %v1673_v2  ;;  %v2726_v2 = vld [vmem:[%s5031_s3 + $0x1f8] sm:$0xff] }
 0xcdd   :  { %3476 = vmatprep.subr.mxu1 %v1672_v54  ;;  %3012 = vmatprep.subr.mxu0 %v2726_v2 }
 0xcde   :  { %3477 = vmatpush3.msra.mxu1 %v1672_v54  ;;  %v2710_v54 = vld [vmem:[%s5031_s3 + $0x178] sm:$0xff] }
 0xcdf   :  { %3478 = vmatprep.subr.mxu1 %v1671_v56 }
 0xce0   :  { %3479 = vmatpush3.msra.mxu1 %v1671_v56  ;;  %v2725_v56 = vld [vmem:[%s5031_s3 + $0x1f0] sm:$0xff] }
 0xce1   :  { %3480 = vmatprep.subr.mxu1 %v1670_v13 }
 0xce2   :  { %3481 = vmatpush3.msra.mxu1 %v1670_v13  ;;  %v2709_v13 = vld [vmem:[%s5031_s3 + $0x170] sm:$0xff] }
 0xce3   :  { %3482 = vmatprep.subr.mxu1 %v1669_v53 }
 0xce4   :  { %3483 = vmatpush3.msra.mxu1 %v1669_v53  ;;  %v2724_v53 = vld [vmem:[%s5031_s3 + $0x1e8] sm:$0xff] }
 0xce5   :  { %2169 = vmatprep.subr.mxu1 %v2692_v11  ;;  %v2109_v11 = vrot.slane %v4820_v14, %v3804_v42 }
 0xd85   :  { %v3451_v12 = vpop.f32.mrf.mxu1 }
 0xd86   :  { %3554 = vrcp.f32 %v3451_v12  ;;  %v2705_v12 = vld [vmem:[%s5031_s3 + $0x150] sm:$0xff] }
 0xd87   :  { %v1890_v35 = vpop.f32.mrf.mxu1 }
 0xd88   :  { %3556 = vrcp.f32 %v1890_v35  ;;  %v2720_v35 = vld [vmem:[%s5031_s3 + $0x1c8] sm:$0xff] }
 0xd93   :  { %v3555_v27 = vpop.eup %3554 }
 0xd94   :  { %v1902_v45 = vmul.f32 %v3555_v27, %v4754_v37  ;;  %v2687_v37 = vld [vmem:[%s5030_s2 + $0xd0] sm:$0xff]  ;;  %v2704_v27 = vld [vmem:[%s5031_s3 + $0x148] sm:$0xff] }
 0xd95   :  { %v3557_v31 = vpop.eup %3556 }
 0xd96   :  { %v1900_v1 = vmul.f32 %v3557_v31, %v4752_v36  ;;  %v2688_v36 = vld [vmem:[%s5030_s2 + $0xd8] sm:$0xff]  ;;  %v2719_v31 = vld [vmem:[%s5031_s3 + $0x1c0] sm:$0xff] }
 0xd98   :  { %3484 = vmatprep.mubr.f32.mxu1 %v1900_v1  ;;  %v2703_v1 = vld [vmem:[%s5031_s3 + $0x140] sm:$0xff] }
 0xd99   :  { %3485 = vmatmul.mubr.f32.vlgmr.msra.gmra.mxu1 %v1902_v45  ;;  %v2718_v45 = vld [vmem:[%s5031_s3 + $0x1b8] sm:$0xff] }
 0xd9a   :  { %2217 = vmatprep.mubr.f32.mxu1 %v3655_v32  ;;  %2170 = vmatpush1.msra.mxu1 %v2691_v15 }
 0xd9b   :  { %2171 = vmatprep.subr.mxu1 %v2690_v48 }
 0xd9c   :  { %2172 = vmatpush1.msra.mxu1 %v2689_v33 }
 0xd9d   :  { %2173 = vmatprep.subr.mxu1 %v2688_v36  ;;  %v2712_v36 = vld [vmem:[%s5031_s3 + $0x188] sm:$0xff] }
 0xd9e   :  { %2174 = vmatpush1.msra.mxu1 %v2687_v37  ;;  %v2696_v37 = vld [vmem:[%s5031_s3 + $0x108] sm:$0xff] }
 0xd9f   :  { %2175 = vmatprep.subr.mxu1 %v2686_v0  ;;  %v2711_v0 = vld [vmem:[%s5031_s3 + $0x180] sm:$0xff] }
 0xda0   :  { %2176 = vmatpush1.msra.mxu1 %v2685_v25  ;;  %v2695_v25 = vld [vmem:[%s5031_s3 + $0x100] sm:$0xff] }
 0xda1   :  { %2177 = vmatprep.subr.mxu1 %v2684_v47  ;;  %v3607_v47 = vld [vmem:[%s5033_s5] sm:$0xf] }
 0xda2   :  { %2178 = vmatpush1.msra.mxu1 %v2683_v19  ;;  %v2132_v19 = vrot.slane %v3607_v47, %v3804_v42 }
 0xda3   :  { %2179 = vmatprep.subr.mxu1 %v2682_v7  ;;  %v2136_v7 = vrot.slane %v3607_v47, %v4306_v23 }
 0xda4   :  { %2180 = vmatpush1.msra.mxu1 %v2681_v26  ;;  %v2142_v26 = vrot.slane %v2132_v19, %v3804_v42 }
 0xda5   :  { %2181 = vmatprep.subr.mxu1 %v2680_v22  ;;  %v2146_v22 = vrot.slane %v2136_v7, %v3804_v42  ;;  %v2270_v42 = vrot.slane %v4820_v14, %v4306_v23 }
 0xda6   :  { %2182 = vmatpush1.msra.mxu1 %v2679_v34 }
 0xda7   :  { %2183 = vmatprep.subr.mxu1 %v2678_v30 }
 0xda8   :  { %2184 = vmatpush1.msra.mxu1 %v2677_v60 }
 0xe59   :  { %v3486_v20 = vpop.f32.mrf.mxu1 }
 0xe5b   :  { %v1969_v17 = vpop.f32.mrf.mxu1 }
 0xe5c   :  { %3503 = vmatprep.mubr.msk.f32.mxu0 %vm86_vm0, %v1969_v17  ;;  %v2716_v17 = vld [vmem:[%s5031_s3 + $0x1a8] sm:$0xff] }
 0xe5d   :  { %3504 = vmatmul.mubr.msk.f32.vlgmr.msra.gmra.mxu0 %vm86_vm0, %v3486_v20  ;;  %v2701_v20 = vld [vmem:[%s5031_s3 + $0x130] sm:$0xff] }
 0xe5e   :  { %3013 = vmatpush3.msra.mxu0 %v2710_v54 }
 0xe5f   :  { %3014 = vmatprep.subr.mxu0 %v2725_v56 }
 0xe60   :  { %3015 = vmatpush3.msra.mxu0 %v2709_v13 }
 0xe61   :  { %3016 = vmatprep.subr.mxu0 %v2724_v53 }
 0xe62   :  { %3017 = vmatpush3.msra.mxu0 %v2708_v43 }
 0xe63   :  { %3018 = vmatprep.subr.mxu0 %v2723_v51 }
 0xe64   :  { %3019 = vmatpush3.msra.mxu0 %v2707_v49 }
 0xe65   :  { %3020 = vmatprep.subr.mxu0 %v2722_v44 }
 0xe66   :  { %3021 = vmatpush3.msra.mxu0 %v2706_v18 }
 0xe67   :  { %3022 = vmatprep.subr.mxu0 %v2721_v41 }
 0xe68   :  { %3023 = vmatpush3.msra.mxu0 %v2705_v12 }
 0xe69   :  { %3024 = vmatprep.subr.mxu0 %v2720_v35 }
 0xe6a   :  { %3025 = vmatpush3.msra.mxu0 %v2704_v27 }
 0xe6b   :  { %3026 = vmatprep.subr.mxu0 %v2719_v31 }
 0xe6c   :  { %3027 = vmatpush3.msra.mxu0 %v2703_v1 }
 0xe6d   :  { %3028 = vmatprep.subr.mxu0 %v2718_v45 }
 0xe6e   :  { %3029 = vmatpush3.msra.mxu0 %v2702_v46 }
 0xe6f   :  { %3030 = vmatprep.subr.mxu0 %v2717_v50 }
 0xe70   :  { %3031 = vmatpush3.msra.mxu0 %v2701_v20 }
 0xe71   :  { %3032 = vmatprep.subr.mxu0 %v2716_v17 }
 0xf1d   :  { %v3505_v21 = vpop.f32.mrf.mxu0 }
 0xf1e   :  { %v2069_v16 = vadd.f32 %v3505_v21, %v1990_v24  ;;  %v2715_v21 = vld [vmem:[%s5031_s3 + $0x1a0] sm:$0xff] }
 0xf1f   :  { %v2063_v52 = vpop.f32.mrf.mxu0 }
 0xf20   :  { %v4825_v55 = vadd.f32 %v2069_v16, %v4358_v10  ;;  %v2064_v28 = vadd.f32 %v2063_v52, %v1990_v24  ;;  %v2700_v24 = vld [vmem:[%s5031_s3 + $0x128] sm:$0xff]  ;;  %v2699_v16 = vld [vmem:[%s5031_s3 + $0x120] sm:$0xff] }
 0xf21   :  { %3033 = vmatpush3.msra.mxu0 %v2700_v24 }
 0xf22   :  { %v4828_v57 = vadd.f32 %v2064_v28, %v4353_v5  ;;  %v2077_v58 = vsel %vm86_vm0, %v4825_v55, 0.0  ;;  %3034 = vmatprep.subr.mxu0 %v2715_v21 }
 0xf23   :  { %2078 = vadd.xlane.f32.xlu1 %v2077_v58  ;;  %3035 = vmatpush3.msra.mxu0 %v2699_v16 }
 0xf24   :  { %v2074_v59 = vsel %vm86_vm0, %v4828_v57, 0.0 }
 0xf25   :  { %2075 = vadd.xlane.f32.xlu0 %v2074_v59 }
 0xfac   :  { %v2079_v61 = vpop.xlane.xlu1 %2078 }
 0xfad   :  { %v2081_v29 = vmul.f32 0.015625, %v2079_v61 }
 0xfae   :  { %v2076_v63 = vpop.xlane.xlu0 %2075 }
 0xfaf   :  { %v4835_v62 = vsub.f32 %v4825_v55, %v2081_v29  ;;  %v2080_v10 = vmul.f32 0.015625, %v2076_v63 }
 0xfb1   :  { %v4838_v3 = vsub.f32 %v4828_v57, %v2080_v10  ;;  %v2085_v5 = vmul.f32 %v4835_v62, %v4835_v62 }
 0xfb3   :  { %v2089_v4 = vsel %vm86_vm0, %v2085_v5, 0.0  ;;  %v2084_v6 = vmul.f32 %v4838_v3, %v4838_v3 }
 0xfb4   :  { %2090 = vadd.xlane.f32.xlu1 %v2089_v4  ;;  %v2103_v4 = vrot.slane %v4820_v14, %v3796_v40  ;;  %v2698_v40 = vld [vmem:[%s5031_s3 + $0x118] sm:$0xff] }
 0xfb5   :  { %v2086_v8 = vsel %vm86_vm0, %v2084_v6, 0.0 }
 0xfb6   :  { %2087 = vadd.xlane.f32.xlu0 %v2086_v8 }
0x103d   :  { %v2091_v52 = vpop.xlane.xlu1 %2090 }
0x103e   :  { %v2093_v28 = vmul.f32 0.015625, %v2091_v52 }
0x103f   :  { %v2088_v58 = vpop.xlane.xlu0 %2087 }
0x1040   :  { %v2095_v59 = vadd.f32 1e-05, %v2093_v28  ;;  %v2092_v61 = vmul.f32 0.015625, %v2088_v58 }
0x1042   :  { %3558 = vrsqrt.f32 %v2095_v59  ;;  %v2094_v29 = vadd.f32 1e-05, %v2092_v61 }
0x1044   :  { %3560 = vrsqrt.f32 %v2094_v29  ;;  %v2393_v29 = vld [vmem:[#allocation2 + $0x38] sm:$0xff] }
0x1045   :  { %3506 = vmatprep.subr.mxu1 %v2393_v29 }
0x104f   :  { %v3559_v63 = vpop.eup %3558 }
0x1050   :  { %v2099_v6 = vmul.f32 %v3559_v63, %v4835_v62  ;;  %v2713_v62 = vld [vmem:[%s5031_s3 + $0x190] sm:$0xff]  ;;  %v2391_v63 = vld [vmem:[#allocation2 + $0x28] sm:$0xff] }
0x1051   :  { %v3561_v10 = vpop.eup %3560 }
0x1052   :  { %v2098_v5 = vmul.f32 %v3561_v10, %v4838_v3  ;;  %v2105_v48 = vmul.f32 %v2103_v4, %v2099_v6  ;;  %v2714_v3 = vld [vmem:[%s5031_s3 + $0x198] sm:$0xff]  ;;  %v2390_v10 = vld [vmem:[#allocation2 + $0x20] sm:$0xff]  ;;  %v2387_v6 = vld [vmem:[#allocation2 + $0x8] sm:$0xff] }
0x1053   :  { %3036 = vmatprep.subr.mxu0 %v2714_v3 }
0x1054   :  { %v2104_v8 = vmul.f32 %v2103_v4, %v2098_v5  ;;  %v2111_v33 = vadd.f32 %v2109_v11, %v2105_v48  ;;  %3037 = vmatpush3.msra.mxu0 %v2698_v40  ;;  %v2389_v5 = vld [vmem:[#allocation2 + $0x18] sm:$0xff]  ;;  %v2388_v4 = vld [vmem:[#allocation2 + $0x10] sm:$0xff] }
0x1055   :  { %3038 = vmatprep.subr.mxu0 %v2713_v62  ;;  %v2377_v62 = vrot.slane %v4820_v14, %v859_v9 }
0x1056   :  { %v2110_v15 = vadd.f32 %v2109_v11, %v2104_v8  ;;  %v2386_v8 = vld [vmem:[#allocation2] sm:$0xff] }
0x1058   :  { %2693 = vmatmul.mubr.msk.f32.vlgmr.msra.gmra.mxu1 %vm86_vm0, %v2110_v15 }
0x1059   :  { %2223 = vmatprep.mubr.f32.mxu1 %v3655_v32  ;;  %v2697_v32 = vld [vmem:[%s5031_s3 + $0x110] sm:$0xff]  ;;  %3507 = vmatpush3.msra.mxu1 %v2393_v29  ;;  %s3656_s3 = smov [#allocation5]  }
0x105a   :  { %3039 = vmatpush3.msra.mxu0 %v2697_v32  ;;  %s2499_s5 = sshll.u32 %s3656_s3, 4  ;;  %s2500_s5 = int_to_ptr.vmem [resolvable:$true] %s2499_s5 }
0x105b   :  { %3040 = vmatprep.subr.mxu0 %v2712_v36  ;;  %v2383_v36 = vrot.slane %v4820_v14, %v1138_v38  ;;  %s3628_s22 = scalar_lea.vmem %s2500_s5, 256  ;;  %p3633_p6 = scmp.lt.s32.totalorder %s2500_s5, %s2500_s5 }
0x105c   :  { %2694 = vmatmul.mubr.msk.f32.gmra.mxu1 %vm86_vm0, %v2111_v33  ;;  %3041 = vmatpush3.msra.mxu0 %v2696_v37  ;;  %p3629_p5 = scmp.ne.s32.totalorder %s2500_s5, %s3628_s22  ;;  %p3634_p7 = scmp.lt.s32.totalorder %s3628_s22, %s3628_s22 }
0x105d   :  { %3042 = vmatprep.subr.mxu0 %v2711_v0 }
0x105e   :  { %3043 = vmatpush3.msra.mxu0 %v2695_v25  ;;  %p3635_p8 = por %p3634_p7, %p3633_p6 }
0x1060   :  { %p3636_p9 = pnand %p3635_p8, %p3629_p5 }
0x1118   :  { %v2219_v34 = vpop.f32.mrf.mxu1 }
0x1119   :  { %v2220_v30 = vadd.f32 %v2219_v34, %v2142_v26  ;;  %v2727_v34 = vld [vmem:[#allocation2 + $0x40] ss:$0 sm:$0xff] }
0x111a   :  { %v2221_v60 = vpop.f32.mrf.mxu1 }
0x111b   :  { %v2222_v2 = vadd.f32 %v2221_v60, %v2146_v22  ;;  %v2230_v13 = vmax.f32 %v2220_v30, 0.0 }
0x111c   :  { %v2225_v54 = vpop.f32.mrf.mxu1 }
0x111d   :  { %v2231_v56 = vmax.f32 %v2222_v2, 0.0  ;;  %v2226_v53 = vadd.f32 %v2225_v54, %v2142_v26 }
0x111e   :  { %v2227_v43 = vpop.f32.mrf.mxu1 }
0x111f   :  { %v2228_v51 = vadd.f32 %v2227_v43, %v2146_v22  ;;  %2335 = vmatprep.mubr.f32.mxu0 %v2231_v56  ;;  %v2232_v44 = vmax.f32 %v2226_v53, 0.0 }
0x1120   :  { %2336 = vmatmul.mubr.f32.vlgmr.msra.gmra.mxu0 %v2230_v13 }
0x1121   :  { %v2233_v49 = vmax.f32 %v2228_v51, 0.0 }
0x1123   :  { %2340 = vmatprep.mubr.f32.mxu0 %v2233_v49 }
0x1124   :  { %2341 = vmatmul.mubr.f32.gmra.mxu0 %v2232_v44 }
0x11e0   :  { %v3044_v18 = vpop.f32.mrf.mxu0 }
0x11e2   :  { %v3045_v41 = vpop.f32.mrf.mxu0 }
0x11e3   :  { %v3046_v12 = vadd.f32 %v3045_v41, %v3044_v18 }
0x11e4   :  { %v3047_v35 = vpop.f32.mrf.mxu0 }
0x11e5   :  { %v2338_v27 = vadd.f32 %v3046_v12, %v2270_v42 }
0x11e6   :  { %v3048_v31 = vpop.f32.mrf.mxu0 }
0x11e7   :  { %v3049_v1 = vadd.f32 %v3048_v31, %v3047_v35  ;;  %v2346_v45 = vadd.f32 %v2338_v27, %v4828_v57 }
0x11e9   :  { %v2343_v46 = vadd.f32 %v3049_v1, %v2270_v42  ;;  %v2348_v50 = vsel %vm86_vm0, %v2346_v45, 0.0 }
0x11ea   :  { %2349 = vadd.xlane.f32.xlu0 %v2348_v50 }
0x11eb   :  { %v2347_v20 = vadd.f32 %v2343_v46, %v4825_v55  ;;  %v2392_v55 = vld [vmem:[#allocation2 + $0x30] sm:$0xff] }
0x11ec   :  { %3508 = vmatprep.subr.mxu1 %v2392_v55 }
0x11ed   :  { %v2351_v17 = vsel %vm86_vm0, %v2347_v20, 0.0  ;;  %3509 = vmatpush3.msra.mxu1 %v2392_v55 }
0x11ee   :  { %2352 = vadd.xlane.f32.xlu1 %v2351_v17  ;;  %3510 = vmatprep.subr.mxu1 %v2391_v63 }
0x11ef   :  { %3511 = vmatpush3.msra.mxu1 %v2391_v63 }
0x11f0   :  { %3512 = vmatprep.subr.mxu1 %v2390_v10 }
0x11f1   :  { %3513 = vmatpush3.msra.mxu1 %v2390_v10 }
0x11f2   :  { %3514 = vmatprep.subr.mxu1 %v2389_v5 }
0x11f3   :  { %3515 = vmatpush3.msra.mxu1 %v2389_v5 }
0x11f4   :  { %3516 = vmatprep.subr.mxu1 %v2388_v4 }
0x11f5   :  { %3517 = vmatpush3.msra.mxu1 %v2388_v4 }
0x11f6   :  { %3518 = vmatprep.subr.mxu1 %v2387_v6 }
0x11f7   :  { %3519 = vmatpush3.msra.mxu1 %v2387_v6 }
0x11f8   :  { %3520 = vmatprep.subr.mxu1 %v2386_v8 }
0x11f9   :  { %3521 = vmatpush3.msra.mxu1 %v2386_v8 }
0x1273   :  { %v2350_v24 = vpop.xlane.xlu0 %2349 }
0x1274   :  { %v2354_v21 = vmul.f32 0.015625, %v2350_v24 }
0x1276   :  { %v2356_v23 = vsub.f32 %v2346_v45, %v2354_v21 }
0x1277   :  { %v2353_v16 = vpop.xlane.xlu1 %2352 }
0x1278   :  { %v2355_v52 = vmul.f32 0.015625, %v2353_v16  ;;  %v2358_v28 = vmul.f32 %v2356_v23, %v2356_v23 }
0x127a   :  { %v2357_v58 = vsub.f32 %v2347_v20, %v2355_v52  ;;  %v2360_v59 = vsel %vm86_vm0, %v2358_v28, 0.0 }
0x127b   :  { %2361 = vadd.xlane.f32.xlu0 %v2360_v59 }
0x127c   :  { %v2359_v57 = vmul.f32 %v2357_v58, %v2357_v58 }
0x127e   :  { %v2363_v61 = vsel %vm86_vm0, %v2359_v57, 0.0 }
0x127f   :  { %2364 = vadd.xlane.f32.xlu1 %v2363_v61 }
0x1304   :  { %v2362_v11 = vpop.xlane.xlu0 %2361 }
0x1305   :  { %v2366_v15 = vmul.f32 0.015625, %v2362_v11 }
0x1307   :  { %v2368_v48 = vadd.f32 1e-05, %v2366_v15 }
0x1308   :  { %v2365_v33 = vpop.xlane.xlu1 %2364 }
0x1309   :  { %3562 = vrsqrt.f32 %v2368_v48  ;;  %v2367_v3 = vmul.f32 0.015625, %v2365_v33 }
0x130b   :  { %v2369_v40 = vadd.f32 1e-05, %v2367_v3 }
0x130d   :  { %3564 = vrsqrt.f32 %v2369_v40 }
0x1316   :  { %v3563_v32 = vpop.eup %3562 }
0x1317   :  { %v2372_v37 = vmul.f32 %v3563_v32, %v2356_v23 }
0x1319   :  { %v2378_v0 = vmul.f32 %v2377_v62, %v2372_v37 }
0x131a   :  { %v3565_v25 = vpop.eup %3564 }
0x131b   :  { %v2373_v47 = vmul.f32 %v3565_v25, %v2357_v58  ;;  %v2384_v19 = vadd.f32 %v2383_v36, %v2378_v0 }
0x131d   :  { %v2379_v7 = vmul.f32 %v2377_v62, %v2373_v47  ;;  %3522 = vmatprep.mubr.msk.f32.mxu1 %vm86_vm0, %v2384_v19 }
0x131f   :  { %v2385_v26 = vadd.f32 %v2383_v36, %v2379_v7 }
0x1321   :  { %3523 = vmatmul.mubr.msk.f32.vlgmr.msra.gmra.mxu1 %vm86_vm0, %v2385_v26 }
0x13e1   :  { %v3524_v22 = vpop.f32.mrf.mxu1 }
0x13e2   :  { %v2477_v9 = vadd.f32 %v3524_v22, %v2727_v34 }
0x13e3   :  { %v2471_v30 = vpop.f32.mrf.mxu1 }
0x13e4   :  { %v2472_v60 = vadd.f32 %v2727_v34, %v2471_v30 }
0x13e6   :  { %v2480_v2 = vmax.f32 %v2472_v60, %v2477_v9 }
0x13e8   :  { %v2481_v39 = vsub.f32 %v2472_v60, %v2480_v2  ;;  %v2484_v54 = vsub.f32 %v2477_v9, %v2480_v2 }
0x13ea   :  { %v2482_v38 = vmul.f32 1.442695, %v2481_v39  ;;  %v2485_v14 = vmul.f32 1.442695, %v2484_v54 }
0x13ec   :  { %3566 = vpow2.f32 %v2482_v38 }
0x13ed   :  { %3568 = vpow2.f32 %v2485_v14 }
0x13f9   :  { %v3567_v56 = vpop.eup %3566 }
0x13fa   :  { %v3569_v13 = vpop.eup %3568 }
0x13fb   :  { %v2487_v53 = vadd.f32 %v3569_v13, %v3567_v56 }
0x13fd   :  { %3570 = vrcp.f32 %v2487_v53 }
0x140a   :  { %v3571_v43 = vpop.eup %3570 }
0x140b   :  { %v2490_v51 = vmul.f32 %v3571_v43, %v3567_v56  ;;  %v2492_v49 = vmul.f32 %v3571_v43, %v3569_v13 }
0x140d   :  { %2491 = vst [vmem:[#allocation5] sm:$0xff] %v2490_v51  ;;  %2493 = vst [vmem:[#allocation5 + $0x8] sm:$0xff] %v2492_v49 }
0x140e   :  { %3639 = shalt.err (!%p3636_p9)
}
0x140f   :  { %2505 = dma.vmem_to_hbm [thread:$0]  %s2500_s5, 256, %s5037_s9, [#allocation4], %s3653_s12, %s3653_s12, %s3654_s13  }
0x1410   :  { %3650 = dma.done.wait [#allocation4], 256  }
0x1411   :  { %3651 = vsyncadd [#allocation4], 4294967040 }
0x1412   :  { %2509 = vsyncpa [#allocation3], 1 }
0x1413   :  { %2510 = vsyncpa [#allocation4], 1 }

</bundles_post_ra>
